<compile_context>
chip_gen: v7x
topology: tpu7x:2x2x1
jax: 0.10.0
libtpu: 0.0.40
codegen_flags: <defaults>
</compile_context>

<pallas_src>
import functools

import numpy as np
import jax
import jax.numpy as jnp
from jax.experimental import pallas as pl
from jax.experimental.pallas import tpu as pltpu

LANE = 128


def _round_up(a, b):
    return (a + b - 1) // b * b


# --------------------------------------------------------------------------
# Kernel: one grid step == one timestep of the mLSTM block.
# --------------------------------------------------------------------------
def mlstm_seq_kernel(
    x_ref,       # (1, B, Dp)   input for this step, zero-padded to Dp lanes
    state0_ref,  # (3, B, H)    [c0, n0, m0] initial recurrent state
    w_up_ref,    # (D, SU+SH)   [w_up_left | w_up_right]  (128-lane segments)
    w_g1_ref,    # (up, 5*SH)   [w_skip | w_q | w_k/sqrt(hs) | w_i | w_f]
    w_g2_ref,    # (up, 2*SH)   [w_v | w_o]
    w_down_ref,  # (H, Dp)      down projection, columns padded to Dp
    pvec_ref,    # (8, PW)      packed per-feature vectors (f32)
    g_ref,       # (H, nh)      GroupNorm group indicator (f32)
    gt_ref,      # (nh, H)      its transpose (f32)
    conv_ref,    # (8,) SMEM    [w0, w1, w2, w3, bias, 0, 0, 0]
    finals_ref,  # (1, B, Dp)   per-step output (lane dense)
    states_ref,  # (B, 4H)      [h | c | n | m] of the LAST step (resident)
    state_scr,   # (3, B, H)    VMEM scratch carrying (c, n, m) across steps
    *, D, Dp, up, H, SU, SH, hs,
):
    f32 = jnp.float32

    @pl.when(pl.program_id(0) == 0)
    def _init():
        state_scr[...] = state0_ref[...]

    def mm(a, w):
        # Big projections: operands in the stored weight dtype (bf16 for perf,
        # f32 for exact parity); accumulation always f32 on the MXU.
        return jnp.dot(a.astype(w.dtype), w, preferred_element_type=f32)

    x_full = x_ref[0]              # (B, Dp), lanes >= D are zero
    x = x_full[:, :D]              # (B, D)

    c_prev = state_scr[0]
    n_prev = state_scr[1]
    m_prev = state_scr[2]

    # Packed per-feature parameter rows (segment-aligned like the weights).
    ln_w = pvec_ref[0:1, :D]
    ln_b = pvec_ref[1:2, :D]
    b_up = pvec_ref[2:3, :SU + SH]
    b_g1 = pvec_ref[3:4, :5 * SH]
    b_g2 = pvec_ref[4:5, :2 * SH]
    gn_w = pvec_ref[5:6, :H]
    gn_b = pvec_ref[6:7, :H]
    b_down = pvec_ref[7:8, :Dp]

    # ---- LayerNorm(input_size), eps=1e-5, biased variance ----
    mu = jnp.mean(x, axis=-1, keepdims=True)
    var = jnp.mean((x - mu) ** 2, axis=-1, keepdims=True)
    x_norm = (x - mu) * jax.lax.rsqrt(var + 1e-5) * ln_w + ln_b

    # ---- fused up projections: x_norm @ [w_upl | w_upr] ----
    up_out = mm(x_norm, w_up_ref[...]) + b_up
    x_up_left = up_out[:, :up]
    x_up_right = up_out[:, SU:SU + H]

    # ---- CausalConv1D(1, 1, 4) over the feature axis ----
    # conv[:, t] = b + w0*x[t-3] + w1*x[t-2] + w2*x[t-1] + w3*x[t]
    # 3 static lane shifts + 4 scalar FMAs on the VPU; no (up, up) band matmul.
    w0 = conv_ref[0]
    w1 = conv_ref[1]
    w2 = conv_ref[2]
    w3 = conv_ref[3]
    cb = conv_ref[4]
    xpad = jnp.concatenate(
        [jnp.zeros((x_up_left.shape[0], 8), f32), x_up_left], axis=-1)
    sh1 = xpad[:, 7:7 + up]        # x[t-1]
    sh2 = xpad[:, 6:6 + up]        # x[t-2]
    sh3 = xpad[:, 5:5 + up]        # x[t-3]
    conv = cb + w3 * x_up_left + w2 * sh1 + w1 * sh2 + w0 * sh3
    x_conv = conv * jax.nn.sigmoid(conv)                       # SiLU

    # ---- fused gate / qkv projections (shared-LHS matmuls) ----
    g1 = mm(x_conv, w_g1_ref[...]) + b_g1                      # (B, 5*SH)
    x_skip = g1[:, 0 * SH:0 * SH + H]
    q = g1[:, 1 * SH:1 * SH + H]
    k = g1[:, 2 * SH:2 * SH + H]        # 1/sqrt(head_size) folded at pack time
    i_tilde = g1[:, 3 * SH:3 * SH + H]
    f_tilde = g1[:, 4 * SH:4 * SH + H]

    g2 = mm(x_up_left, w_g2_ref[...]) + b_g2                   # (B, 2*SH)
    v = g2[:, :H]
    o = jax.nn.sigmoid(g2[:, SH:SH + H])

    # ---- mLSTM state update ----
    m_t = jnp.maximum(f_tilde + m_prev, i_tilde)
    i_g = jnp.exp(i_tilde - m_t)
    f_g = jnp.exp(f_tilde + m_prev - m_t)
    c_t = f_g * c_prev + i_g * (v * k)
    n_t = f_g * n_prev + i_g * k

    # denom[j] = max_m |(q^T n_t)[m, j]| — faithful to the PyTorch reference
    # (couples the whole batch, no lower clamp).  Kept in f32 regardless of
    # the weight dtype; exact division (no approx reciprocal).
    qtn = jax.lax.dot_general(q, n_t, (((0,), (0,)), ((), ())),
                              preferred_element_type=f32)      # (H, H)
    denom = jnp.max(jnp.abs(qtn), axis=0, keepdims=True)       # (1, H)
    h_t = o * (c_t * q) / denom

    # ---- GroupNorm(num_heads, H), eps=1e-5, centered two-pass variance ----
    # Tiny f32 indicator matmuls (kept f32 even in bf16 weight mode).
    inv_hs = 1.0 / hs
    G = g_ref[...]
    GT = gt_ref[...]
    grp_mean = jnp.dot(h_t, G, preferred_element_type=f32) * inv_hs
    mean_full = jnp.dot(grp_mean, GT, preferred_element_type=f32)
    d = h_t - mean_full
    grp_var = jnp.dot(d * d, G, preferred_element_type=f32) * inv_hs
    var_full = jnp.dot(grp_var, GT, preferred_element_type=f32)
    out_norm = d * jax.lax.rsqrt(var_full + 1e-5) * gn_w + gn_b

    # ---- gated output, down projection, residual ----
    out = (out_norm + x_skip) * (x_up_right * jax.nn.sigmoid(x_up_right))
    final = mm(out, w_down_ref[...]) + b_down + x_full         # (B, Dp)

    finals_ref[0] = final                                      # lane-dense store

    # Carry recurrent state in VMEM; expose last-step state once via the
    # resident (B, 4H = 128 lane) output block.
    state_scr[0] = c_t
    state_scr[1] = n_t
    state_scr[2] = m_t
    states_ref[:, 0 * H:1 * H] = h_t
    states_ref[:, 1 * H:2 * H] = c_t
    states_ref[:, 2 * H:3 * H] = n_t
    states_ref[:, 3 * H:4 * H] = m_t


# --------------------------------------------------------------------------
# Host-side parameter handling
# --------------------------------------------------------------------------
def init_params(key, input_size, head_size, num_heads, proj_factor=2):
    """Random parameters mirroring the PyTorch module (Linear weights stored
    pre-transposed as (in, out); BlockDiagonal is functionally a dense Linear)."""
    up = int(input_size * proj_factor)
    hidden = head_size * num_heads

    def lin(k, fan_in, fan_out):
        kw, kb = jax.random.split(k)
        w = jax.random.normal(kw, (fan_in, fan_out), jnp.float32) * 0.1
        b = jax.random.normal(kb, (1, fan_out), jnp.float32) * 0.01
        return w, b

    keys = iter(jax.random.split(key, 16))
    p = {}
    p["ln_w"] = 1.0 + 0.1 * jax.random.normal(next(keys), (1, input_size), jnp.float32)
    p["ln_b"] = 0.05 * jax.random.normal(next(keys), (1, input_size), jnp.float32)
    p["w_upl"], p["b_upl"] = lin(next(keys), input_size, up)
    p["w_upr"], p["b_upr"] = lin(next(keys), input_size, hidden)
    p["conv_w"] = jax.random.normal(next(keys), (1, 4), jnp.float32) * 0.3
    p["conv_b"] = jax.random.normal(next(keys), (1, 1), jnp.float32) * 0.01
    p["w_skip"], p["b_skip"] = lin(next(keys), up, hidden)
    for name in ("q", "k", "v", "i", "f", "o"):
        p[f"w_{name}"], p[f"b_{name}"] = lin(next(keys), up, hidden)
    p["gn_w"] = 1.0 + 0.1 * jax.random.normal(next(keys), (1, hidden), jnp.float32)
    p["gn_b"] = 0.05 * jax.random.normal(next(keys), (1, hidden), jnp.float32)
    p["w_down"], p["b_down"] = lin(next(keys), hidden, input_size)
    return p


def pack_params(params, *, input_size, head_size, num_heads, proj_factor,
                weight_dtype=jnp.bfloat16):
    """Fuse / pack parameters into the kernel operands.

    Each fused weight column block is padded to a 128-lane segment so every
    post-matmul slice in the kernel starts on a vreg boundary.  Large weights
    are stored in `weight_dtype` (bf16 by default); per-feature vectors stay f32.
    """
    f32 = jnp.float32
    D = input_size
    H = head_size * num_heads
    up = int(input_size * proj_factor)
    nh, hs = num_heads, head_size
    SU = _round_up(up, LANE)
    SH = _round_up(H, LANE)
    Dp = _round_up(D, LANE)
    scale = 1.0 / (head_size ** 0.5)

    def seg_cols(pieces):
        return jnp.concatenate(
            [jnp.pad(m.astype(f32), ((0, 0), (0, w - m.shape[1])))
             for m, w in pieces], axis=1)

    w_up = seg_cols([(params["w_upl"], SU), (params["w_upr"], SH)])
    w_g1 = seg_cols([(params["w_skip"], SH), (params["w_q"], SH),
                     (params["w_k"] * scale, SH), (params["w_i"], SH),
                     (params["w_f"], SH)])
    w_g2 = seg_cols([(params["w_v"], SH), (params["w_o"], SH)])
    w_down = seg_cols([(params["w_down"], Dp)])

    PW = max(D, SU + SH, 5 * SH, 2 * SH, Dp, H)

    def seg_row(pieces):
        parts = []
        for v, w in pieces:
            v = v.reshape(-1).astype(f32)
            parts.append(jnp.pad(v, (0, w - v.shape[0])))
        r = jnp.concatenate(parts)
        return jnp.pad(r, (0, PW - r.shape[0]))

    pvec = jnp.stack([
        seg_row([(params["ln_w"], D)]),
        seg_row([(params["ln_b"], D)]),
        seg_row([(params["b_upl"], SU), (params["b_upr"], SH)]),
        seg_row([(params["b_skip"], SH), (params["b_q"], SH),
                 (params["b_k"] * scale, SH), (params["b_i"], SH),
                 (params["b_f"], SH)]),
        seg_row([(params["b_v"], SH), (params["b_o"], SH)]),
        seg_row([(params["gn_w"], H)]),
        seg_row([(params["gn_b"], H)]),
        seg_row([(params["b_down"], Dp)]),
    ], axis=0)

    conv = jnp.concatenate([params["conv_w"].reshape(-1),
                            params["conv_b"].reshape(-1),
                            jnp.zeros((3,), f32)]).astype(f32)      # (8,)

    ch = jnp.arange(H)
    grp = jnp.arange(nh)
    G = (ch[:, None] // hs == grp[None, :]).astype(f32)             # (H, nh)
    GT = jnp.transpose(G)                                           # (nh, H)

    return dict(w_up=w_up.astype(weight_dtype), w_g1=w_g1.astype(weight_dtype),
                w_g2=w_g2.astype(weight_dtype),
                w_down=w_down.astype(weight_dtype),
                pvec=pvec, conv=conv, G=G, GT=GT)


# --------------------------------------------------------------------------
# Wrappers
# --------------------------------------------------------------------------
def mlstm_block_seq(xs, prev_state, packed, *, input_size, head_size,
                    num_heads, proj_factor=2):
    """Run T sequential steps of the mLSTM block in ONE pallas_call.

    xs: (T, B, input_size).  prev_state: (h, c, n, m), each (B, hidden).
    Returns (finals (T, B, input_size), (h_T, c_T, n_T, m_T)).
    """
    _h_prev, c_prev, n_prev, m_prev = prev_state   # h_prev unused by forward
    T, B, D = xs.shape
    assert D == input_size
    H = head_size * num_heads
    up = int(input_size * proj_factor)
    SU = _round_up(up, LANE)
    SH = _round_up(H, LANE)
    Dp = _round_up(D, LANE)

    xs_p = jnp.pad(xs.astype(jnp.float32), ((0, 0), (0, 0), (0, Dp - D)))
    state0 = jnp.stack([c_prev, n_prev, m_prev], axis=0).astype(jnp.float32)

    kernel = functools.partial(
        mlstm_seq_kernel, D=D, Dp=Dp, up=up, H=H, SU=SU, SH=SH, hs=head_size)

    def resident(arr):
        # Full-shape block + constant index_map -> fetched once, VMEM-resident.
        if arr.ndim == 2:
            return pl.BlockSpec(arr.shape, lambda t: (0, 0))
        return pl.BlockSpec(arr.shape, lambda t: (0, 0, 0))

    grid_spec = pltpu.PrefetchScalarGridSpec(
        num_scalar_prefetch=0,
        grid=(T,),
        in_specs=[
            pl.BlockSpec((1, B, Dp), lambda t: (t, 0, 0)),        # x, per step
            resident(state0),
            resident(packed["w_up"]),
            resident(packed["w_g1"]),
            resident(packed["w_g2"]),
            resident(packed["w_down"]),
            resident(packed["pvec"]),
            resident(packed["G"]),
            resident(packed["GT"]),
            pl.BlockSpec(memory_space=pltpu.MemorySpace.SMEM),    # conv taps
        ],
        out_specs=[
            pl.BlockSpec((1, B, Dp), lambda t: (t, 0, 0)),        # per-step out
            pl.BlockSpec((B, 4 * H), lambda t: (0, 0)),           # last state
        ],
        scratch_shapes=[pltpu.VMEM((3, B, H), jnp.float32)],
    )

    finals_p, states = pl.pallas_call(
        kernel,
        grid_spec=grid_spec,
        out_shape=(
            jax.ShapeDtypeStruct((T, B, Dp), jnp.float32),
            jax.ShapeDtypeStruct((B, 4 * H), jnp.float32),
        ),
        compiler_params=pltpu.CompilerParams(
            dimension_semantics=("arbitrary",),        # sequential recurrence
            vmem_limit_bytes=48 * 1024 * 1024),        # fits v7x 64 MiB VMEM
    )(xs_p, state0, packed["w_up"], packed["w_g1"], packed["w_g2"],
      packed["w_down"], packed["pvec"], packed["G"], packed["GT"],
      packed["conv"])

    finals = finals_p[:, :, :D]
    h_t = states[:, 0 * H:1 * H]
    c_t = states[:, 1 * H:2 * H]
    n_t = states[:, 2 * H:3 * H]
    m_t = states[:, 3 * H:4 * H]
    return finals, (h_t, c_t, n_t, m_t)


def mlstm_block(x, prev_state, packed, **kwargs):
    """Single-step forward, same semantics as mLSTMBlock.forward."""
    finals, state = mlstm_block_seq(x[None], prev_state, packed, **kwargs)
    return finals[0], state


# --------------------------------------------------------------------------
# Pure-JAX reference (direct transcription of the PyTorch forward)
# --------------------------------------------------------------------------
def mlstm_block_ref(x, prev_state, p, *, head_size, num_heads):
    _h, c_prev, n_prev, m_prev = prev_state
    eps = 1e-5
    mu = x.mean(-1, keepdims=True)
    var = ((x - mu) ** 2).mean(-1, keepdims=True)
    x_norm = (x - mu) / jnp.sqrt(var + eps) * p["ln_w"] + p["ln_b"]
    x_up_left = x_norm @ p["w_upl"] + p["b_upl"]
    x_up_right = x_norm @ p["w_upr"] + p["b_upr"]

    w = p["conv_w"].reshape(-1)
    b = p["conv_b"].reshape(())
    L = x_up_left.shape[-1]
    xp = jnp.pad(x_up_left, ((0, 0), (3, 0)))
    conv = b + sum(w[kk] * xp[:, kk:kk + L] for kk in range(4))
    x_conv = conv * jax.nn.sigmoid(conv)

    x_skip = x_conv @ p["w_skip"] + p["b_skip"]
    q = x_conv @ p["w_q"] + p["b_q"]
    k_ = (x_conv @ p["w_k"] + p["b_k"]) / (head_size ** 0.5)
    v = x_up_left @ p["w_v"] + p["b_v"]
    i_t = x_conv @ p["w_i"] + p["b_i"]
    f_t = x_conv @ p["w_f"] + p["b_f"]
    o = jax.nn.sigmoid(x_up_left @ p["w_o"] + p["b_o"])

    m_t = jnp.maximum(f_t + m_prev, i_t)
    i_g = jnp.exp(i_t - m_t)
    f_g = jnp.exp(f_t + m_prev - m_t)
    c_t = f_g * c_prev + i_g * (v * k_)
    n_t = f_g * n_prev + i_g * k_

    denom = jnp.max(jnp.abs(n_t.T @ q), axis=1)      # (H,)
    h_t = o * (c_t * q) / denom

    B, H = h_t.shape
    nh, hs = num_heads, head_size
    hr = h_t.reshape(B, nh, hs)
    gmu = hr.mean(-1, keepdims=True)
    gvar = ((hr - gmu) ** 2).mean(-1, keepdims=True)
    hn = ((hr - gmu) / jnp.sqrt(gvar + eps)).reshape(B, H)
    hn = hn * p["gn_w"] + p["gn_b"]

    out = (hn + x_skip) * (x_up_right * jax.nn.sigmoid(x_up_right))
    out = out @ p["w_down"] + p["b_down"]
    return out + x, (h_t, c_t, n_t, m_t)


def mlstm_seq_ref(xs, prev_state, p, *, head_size, num_heads):
    state = prev_state
    outs = []
    for t in range(xs.shape[0]):
        out, state = mlstm_block_ref(xs[t], state, p,
                                     head_size=head_size, num_heads=num_heads)
        outs.append(out)
    return jnp.stack(outs, axis=0), state


if __name__ == "__main__":
    input_size, head_size, num_heads, proj_factor = 16, 8, 4, 2
    batch, T = 8, 12
    hidden = head_size * num_heads   # 32 -> 4H = 128-lane state slab

    key = jax.random.PRNGKey(0)
    kx, kp = jax.random.split(key)
    xs = jax.random.normal(kx, (T, batch, input_size), jnp.float32)
    zeros = jnp.zeros((batch, hidden), jnp.float32)
    state0 = (zeros, zeros, zeros, zeros)

    params = init_params(kp, input_size, head_size, num_heads, proj_factor)

    with jax.default_matmul_precision("float32"):
        finals_r, (h_r, c_r, n_r, m_r) = mlstm_seq_ref(
            xs, state0, params, head_size=head_size, num_heads=num_heads)
        f1_r, (h1_r, _c1_r, _n1_r, _m1_r) = mlstm_block_ref(
            xs[0], state0, params, head_size=head_size, num_heads=num_heads)

    common = dict(input_size=input_size, head_size=head_size,
                  num_heads=num_heads, proj_factor=proj_factor)

    # --- f32 weights: exact-parity path ------------------------------------
    packed_f32 = pack_params(params, weight_dtype=jnp.float32, **common)
    finals, (h_t, c_t, n_t, m_t) = mlstm_block_seq(xs, state0, packed_f32,
                                                   **common)
    jax.block_until_ready((finals, h_t, c_t, n_t, m_t))

    assert finals.shape == (T, batch, input_size)
    assert h_t.shape == c_t.shape == n_t.shape == m_t.shape == (batch, hidden)

    for got, want in ((finals, finals_r), (h_t, h_r), (c_t, c_r),
                      (n_t, n_r), (m_t, m_r)):
        np.testing.assert_allclose(np.asarray(got), np.asarray(want),
                                   rtol=5e-2, atol=5e-2)

    # Single-step wrapper (module-equivalent API), checked against one step.
    f1, (h1, _c1, _n1, _m1) = mlstm_block(xs[0], state0, packed_f32, **common)
    jax.block_until_ready(f1)
    np.testing.assert_allclose(np.asarray(f1), np.asarray(f1_r),
                               rtol=2e-2, atol=2e-2)
    np.testing.assert_allclose(np.asarray(h1), np.asarray(h1_r),
                               rtol=2e-2, atol=2e-2)

    # --- bf16 weights (default perf path): loose check ----------------------
    packed_bf16 = pack_params(params, weight_dtype=jnp.bfloat16, **common)
    finals_b, state_b = mlstm_block_seq(xs, state0, packed_bf16, **common)
    jax.block_until_ready(finals_b)
    assert bool(jnp.all(jnp.isfinite(finals_b)))
    # bf16 MXU operand rounding accumulates over the 12-step recurrence.
    np.testing.assert_allclose(np.asarray(finals_b), np.asarray(finals_r),
                               rtol=2e-1, atol=2e-1)

    print("KERNEL_OK")
</pallas_src>

<mosaic_0001>
module attributes {stable_mosaic.version = 11 : i64} {
  func.func @mlstm_seq_kernel(%arg0: i32, %arg1: memref<1x8x128xf32, #tpu.memory_space<vmem>>, %arg2: memref<3x8x32xf32, #tpu.memory_space<vmem>>, %arg3: memref<16x256xf32, #tpu.memory_space<vmem>>, %arg4: memref<32x640xf32, #tpu.memory_space<vmem>>, %arg5: memref<32x256xf32, #tpu.memory_space<vmem>>, %arg6: memref<32x128xf32, #tpu.memory_space<vmem>>, %arg7: memref<8x640xf32, #tpu.memory_space<vmem>>, %arg8: memref<32x4xf32, #tpu.memory_space<vmem>>, %arg9: memref<4x32xf32, #tpu.memory_space<vmem>>, %arg10: memref<8xf32, #tpu.memory_space<smem>>, %arg11: memref<1x8x128xf32, #tpu.memory_space<vmem>>, %arg12: memref<8x128xf32, #tpu.memory_space<vmem>>, %arg13: memref<3x8x32xf32, #tpu.memory_space<vmem>>) attributes {dimension_semantics = [#tpu.dimension_semantics<arbitrary>], iteration_bounds = array<i64: 12>, scalar_prefetch = 0 : i64, scratch_operands = 1 : i64, tpu.core_type = #tpu.core_type<tc>, window_params = [{transform_indices = @transform_0, window_bounds = array<i64: 1, 8, 128>}, {pipeline_mode = #tpu.pipeline_mode<synchronous>, transform_indices = @transform_1, window_bounds = array<i64: 3, 8, 32>}, {pipeline_mode = #tpu.pipeline_mode<synchronous>, transform_indices = @transform_2, window_bounds = array<i64: 16, 256>}, {pipeline_mode = #tpu.pipeline_mode<synchronous>, transform_indices = @transform_3, window_bounds = array<i64: 32, 640>}, {pipeline_mode = #tpu.pipeline_mode<synchronous>, transform_indices = @transform_4, window_bounds = array<i64: 32, 256>}, {pipeline_mode = #tpu.pipeline_mode<synchronous>, transform_indices = @transform_5, window_bounds = array<i64: 32, 128>}, {pipeline_mode = #tpu.pipeline_mode<synchronous>, transform_indices = @transform_6, window_bounds = array<i64: 8, 640>}, {pipeline_mode = #tpu.pipeline_mode<synchronous>, transform_indices = @transform_7, window_bounds = array<i64: 32, 4>}, {pipeline_mode = #tpu.pipeline_mode<synchronous>, transform_indices = @transform_8, window_bounds = array<i64: 4, 32>}, {transform_indices = @transform_9, window_bounds = array<i64: 8>}, {transform_indices = @transform_10, window_bounds = array<i64: 1, 8, 128>}, {pipeline_mode = #tpu.pipeline_mode<synchronous>, transform_indices = @transform_11, window_bounds = array<i64: 8, 128>}]} {
    %c0_i32 = arith.constant 0 : i32
    %0 = arith.cmpi eq, %arg0, %c0_i32 : i32
    %1 = arith.extui %0 : i1 to i32
    %c0_i32_0 = arith.constant 0 : i32
    %2 = arith.cmpi ne, %1, %c0_i32_0 : i32
    scf.if %2 {
      %c0_76 = arith.constant 0 : index
      %c0_77 = arith.constant 0 : index
      %c0_78 = arith.constant 0 : index
      %168 = vector.load %arg2[%c0_76, %c0_77, %c0_78] : memref<3x8x32xf32, #tpu.memory_space<vmem>>, vector<3x8x32xf32>
      %c0_79 = arith.constant 0 : index
      %c0_80 = arith.constant 0 : index
      %c0_81 = arith.constant 0 : index
      %169 = vector.load %arg13[%c0_79, %c0_80, %c0_81] : memref<3x8x32xf32, #tpu.memory_space<vmem>>, vector<3x8x32xf32>
      tpu.vector_store %arg13[%c0_79, %c0_80, %c0_81], %168 {strides = array<i32>} : memref<3x8x32xf32, #tpu.memory_space<vmem>>, vector<3x8x32xf32>,
    } else {
    }
    %c0 = arith.constant 0 : index
    %c0_1 = arith.constant 0 : index
    %c0_2 = arith.constant 0 : index
    %3 = vector.load %arg1[%c0, %c0_1, %c0_2] : memref<1x8x128xf32, #tpu.memory_space<vmem>>, vector<1x8x128xf32>
    %4 = vector.shape_cast %3 : vector<1x8x128xf32> to vector<8x128xf32>
    %5 = vector.extract_strided_slice %4 {offsets = [0, 0], sizes = [8, 16], strides = [1, 1]} : vector<8x128xf32> to vector<8x16xf32>
    %c0_3 = arith.constant 0 : index
    %c0_4 = arith.constant 0 : index
    %c0_5 = arith.constant 0 : index
    %6 = vector.load %arg13[%c0_3, %c0_4, %c0_5] : memref<3x8x32xf32, #tpu.memory_space<vmem>>, vector<1x8x32xf32>
    %7 = vector.shape_cast %6 : vector<1x8x32xf32> to vector<8x32xf32>
    %c1 = arith.constant 1 : index
    %c0_6 = arith.constant 0 : index
    %c0_7 = arith.constant 0 : index
    %8 = vector.load %arg13[%c1, %c0_6, %c0_7] : memref<3x8x32xf32, #tpu.memory_space<vmem>>, vector<1x8x32xf32>
    %9 = vector.shape_cast %8 : vector<1x8x32xf32> to vector<8x32xf32>
    %c2 = arith.constant 2 : index
    %c0_8 = arith.constant 0 : index
    %c0_9 = arith.constant 0 : index
    %10 = vector.load %arg13[%c2, %c0_8, %c0_9] : memref<3x8x32xf32, #tpu.memory_space<vmem>>, vector<1x8x32xf32>
    %11 = vector.shape_cast %10 : vector<1x8x32xf32> to vector<8x32xf32>
    %c0_10 = arith.constant 0 : index
    %c0_11 = arith.constant 0 : index
    %12 = vector.load %arg7[%c0_10, %c0_11] : memref<8x640xf32, #tpu.memory_space<vmem>>, vector<1x16xf32>
    %c1_12 = arith.constant 1 : index
    %c0_13 = arith.constant 0 : index
    %13 = vector.load %arg7[%c1_12, %c0_13] : memref<8x640xf32, #tpu.memory_space<vmem>>, vector<1x16xf32>
    %c2_14 = arith.constant 2 : index
    %c0_15 = arith.constant 0 : index
    %14 = vector.load %arg7[%c2_14, %c0_15] : memref<8x640xf32, #tpu.memory_space<vmem>>, vector<1x256xf32>
    %c3 = arith.constant 3 : index
    %c0_16 = arith.constant 0 : index
    %15 = vector.load %arg7[%c3, %c0_16] : memref<8x640xf32, #tpu.memory_space<vmem>>, vector<1x640xf32>
    %c4 = arith.constant 4 : index
    %c0_17 = arith.constant 0 : index
    %16 = vector.load %arg7[%c4, %c0_17] : memref<8x640xf32, #tpu.memory_space<vmem>>, vector<1x256xf32>
    %c5 = arith.constant 5 : index
    %c0_18 = arith.constant 0 : index
    %17 = vector.load %arg7[%c5, %c0_18] : memref<8x640xf32, #tpu.memory_space<vmem>>, vector<1x32xf32>
    %c6 = arith.constant 6 : index
    %c0_19 = arith.constant 0 : index
    %18 = vector.load %arg7[%c6, %c0_19] : memref<8x640xf32, #tpu.memory_space<vmem>>, vector<1x32xf32>
    %c7 = arith.constant 7 : index
    %c0_20 = arith.constant 0 : index
    %19 = vector.load %arg7[%c7, %c0_20] : memref<8x640xf32, #tpu.memory_space<vmem>>, vector<1x128xf32>
    %cst = arith.constant dense<0.000000e+00> : vector<8xf32>
    %20 = vector.multi_reduction <add>, %5, %cst [1] : vector<8x16xf32> to vector<8xf32>
    %21 = vector.shape_cast %20 : vector<8xf32> to vector<8x1xf32>
    %cst_21 = arith.constant 1.600000e+01 : f32
    %22 = vector.broadcast %cst_21 : f32 to vector<8x1xf32>
    %23 = arith.divf %21, %22 : vector<8x1xf32>
    %24 = vector.broadcast %23 : vector<8x1xf32> to vector<8x16xf32>
    %25 = arith.subf %5, %24 : vector<8x16xf32>
    %26 = arith.mulf %25, %25 : vector<8x16xf32>
    %cst_22 = arith.constant dense<0.000000e+00> : vector<8xf32>
    %27 = vector.multi_reduction <add>, %26, %cst_22 [1] : vector<8x16xf32> to vector<8xf32>
    %28 = vector.shape_cast %27 : vector<8xf32> to vector<8x1xf32>
    %cst_23 = arith.constant 1.600000e+01 : f32
    %29 = vector.broadcast %cst_23 : f32 to vector<8x1xf32>
    %30 = arith.divf %28, %29 : vector<8x1xf32>
    %31 = vector.broadcast %23 : vector<8x1xf32> to vector<8x16xf32>
    %32 = arith.subf %5, %31 : vector<8x16xf32>
    %cst_24 = arith.constant 9.99999974E-6 : f32
    %33 = vector.broadcast %cst_24 : f32 to vector<8x1xf32>
    %34 = arith.addf %30, %33 : vector<8x1xf32>
    %35 = math.rsqrt %34 : vector<8x1xf32>
    %36 = vector.broadcast %35 : vector<8x1xf32> to vector<8x16xf32>
    %37 = arith.mulf %32, %36 : vector<8x16xf32>
    %38 = vector.broadcast %12 : vector<1x16xf32> to vector<8x16xf32>
    %39 = arith.mulf %37, %38 : vector<8x16xf32>
    %40 = vector.broadcast %13 : vector<1x16xf32> to vector<8x16xf32>
    %41 = arith.addf %39, %40 : vector<8x16xf32>
    %c0_25 = arith.constant 0 : index
    %c0_26 = arith.constant 0 : index
    %42 = vector.load %arg3[%c0_25, %c0_26] : memref<16x256xf32, #tpu.memory_space<vmem>>, vector<16x256xf32>
    %cst_27 = arith.constant dense<0.000000e+00> : vector<8x256xf32>
    %43 = tpu.matmul %41, %42, %cst_27 {dimension_numbers = #tpu.dot_dimension_numbers<[1], [0], [0], [1], [0, 0, 1, 1], [], []>} : vector<8x16xf32>, vector<16x256xf32>, vector<8x256xf32> -> vector<8x256xf32>
    %44 = vector.broadcast %14 : vector<1x256xf32> to vector<8x256xf32>
    %45 = arith.addf %43, %44 : vector<8x256xf32>
    %46 = vector.extract_strided_slice %45 {offsets = [0, 0], sizes = [8, 32], strides = [1, 1]} : vector<8x256xf32> to vector<8x32xf32>
    %47 = vector.extract_strided_slice %45 {offsets = [0, 128], sizes = [8, 32], strides = [1, 1]} : vector<8x256xf32> to vector<8x32xf32>
    %c0_28 = arith.constant 0 : index
    %48 = memref.load %arg10[%c0_28] : memref<8xf32, #tpu.memory_space<smem>>
    %c1_29 = arith.constant 1 : index
    %49 = memref.load %arg10[%c1_29] : memref<8xf32, #tpu.memory_space<smem>>
    %c2_30 = arith.constant 2 : index
    %50 = memref.load %arg10[%c2_30] : memref<8xf32, #tpu.memory_space<smem>>
    %c3_31 = arith.constant 3 : index
    %51 = memref.load %arg10[%c3_31] : memref<8xf32, #tpu.memory_space<smem>>
    %c4_32 = arith.constant 4 : index
    %52 = memref.load %arg10[%c4_32] : memref<8xf32, #tpu.memory_space<smem>>
    %cst_33 = arith.constant 0.000000e+00 : f32
    %53 = vector.broadcast %cst_33 : f32 to vector<8x8xf32>
    %54 = tpu.concatenate %53, %46 in 1 : vector<8x8xf32>, vector<8x32xf32> -> vector<8x40xf32>
    %55 = vector.extract_strided_slice %54 {offsets = [0, 7], sizes = [8, 32], strides = [1, 1]} : vector<8x40xf32> to vector<8x32xf32>
    %56 = vector.extract_strided_slice %54 {offsets = [0, 6], sizes = [8, 32], strides = [1, 1]} : vector<8x40xf32> to vector<8x32xf32>
    %57 = vector.extract_strided_slice %54 {offsets = [0, 5], sizes = [8, 32], strides = [1, 1]} : vector<8x40xf32> to vector<8x32xf32>
    %58 = vector.broadcast %51 : f32 to vector<8x32xf32>
    %59 = arith.mulf %58, %46 : vector<8x32xf32>
    %60 = vector.broadcast %52 : f32 to vector<8x32xf32>
    %61 = arith.addf %60, %59 : vector<8x32xf32>
    %62 = vector.broadcast %50 : f32 to vector<8x32xf32>
    %63 = arith.mulf %62, %55 : vector<8x32xf32>
    %64 = arith.addf %61, %63 : vector<8x32xf32>
    %65 = vector.broadcast %49 : f32 to vector<8x32xf32>
    %66 = arith.mulf %65, %56 : vector<8x32xf32>
    %67 = arith.addf %64, %66 : vector<8x32xf32>
    %68 = vector.broadcast %48 : f32 to vector<8x32xf32>
    %69 = arith.mulf %68, %57 : vector<8x32xf32>
    %70 = arith.addf %67, %69 : vector<8x32xf32>
    %71 = arith.negf %70 : vector<8x32xf32>
    %72 = math.exp %71 : vector<8x32xf32>
    %cst_34 = arith.constant 1.000000e+00 : f32
    %73 = vector.broadcast %cst_34 : f32 to vector<8x32xf32>
    %74 = arith.addf %73, %72 : vector<8x32xf32>
    %75 = arith.divf %73, %74 : vector<8x32xf32>
    %76 = arith.mulf %70, %75 : vector<8x32xf32>
    %c0_35 = arith.constant 0 : index
    %c0_36 = arith.constant 0 : index
    %77 = vector.load %arg4[%c0_35, %c0_36] : memref<32x640xf32, #tpu.memory_space<vmem>>, vector<32x640xf32>
    %cst_37 = arith.constant dense<0.000000e+00> : vector<8x640xf32>
    %78 = tpu.matmul %76, %77, %cst_37 {dimension_numbers = #tpu.dot_dimension_numbers<[1], [0], [0], [1], [0, 0, 1, 1], [], []>} : vector<8x32xf32>, vector<32x640xf32>, vector<8x640xf32> -> vector<8x640xf32>
    %79 = vector.broadcast %15 : vector<1x640xf32> to vector<8x640xf32>
    %80 = arith.addf %78, %79 : vector<8x640xf32>
    %81 = vector.extract_strided_slice %80 {offsets = [0, 0], sizes = [8, 32], strides = [1, 1]} : vector<8x640xf32> to vector<8x32xf32>
    %82 = vector.extract_strided_slice %80 {offsets = [0, 128], sizes = [8, 32], strides = [1, 1]} : vector<8x640xf32> to vector<8x32xf32>
    %83 = vector.extract_strided_slice %80 {offsets = [0, 256], sizes = [8, 32], strides = [1, 1]} : vector<8x640xf32> to vector<8x32xf32>
    %84 = vector.extract_strided_slice %80 {offsets = [0, 384], sizes = [8, 32], strides = [1, 1]} : vector<8x640xf32> to vector<8x32xf32>
    %85 = vector.extract_strided_slice %80 {offsets = [0, 512], sizes = [8, 32], strides = [1, 1]} : vector<8x640xf32> to vector<8x32xf32>
    %c0_38 = arith.constant 0 : index
    %c0_39 = arith.constant 0 : index
    %86 = vector.load %arg5[%c0_38, %c0_39] : memref<32x256xf32, #tpu.memory_space<vmem>>, vector<32x256xf32>
    %cst_40 = arith.constant dense<0.000000e+00> : vector<8x256xf32>
    %87 = tpu.matmul %46, %86, %cst_40 {dimension_numbers = #tpu.dot_dimension_numbers<[1], [0], [0], [1], [0, 0, 1, 1], [], []>} : vector<8x32xf32>, vector<32x256xf32>, vector<8x256xf32> -> vector<8x256xf32>
    %88 = vector.broadcast %16 : vector<1x256xf32> to vector<8x256xf32>
    %89 = arith.addf %87, %88 : vector<8x256xf32>
    %90 = vector.extract_strided_slice %89 {offsets = [0, 0], sizes = [8, 32], strides = [1, 1]} : vector<8x256xf32> to vector<8x32xf32>
    %91 = vector.extract_strided_slice %89 {offsets = [0, 128], sizes = [8, 32], strides = [1, 1]} : vector<8x256xf32> to vector<8x32xf32>
    %92 = arith.negf %91 : vector<8x32xf32>
    %93 = math.exp %92 : vector<8x32xf32>
    %cst_41 = arith.constant 1.000000e+00 : f32
    %94 = vector.broadcast %cst_41 : f32 to vector<8x32xf32>
    %95 = arith.addf %94, %93 : vector<8x32xf32>
    %96 = arith.divf %94, %95 : vector<8x32xf32>
    %97 = arith.addf %85, %11 : vector<8x32xf32>
    %98 = arith.maximumf %97, %84 : vector<8x32xf32>
    %99 = arith.subf %84, %98 : vector<8x32xf32>
    %100 = math.exp %99 : vector<8x32xf32>
    %101 = arith.addf %85, %11 : vector<8x32xf32>
    %102 = arith.subf %101, %98 : vector<8x32xf32>
    %103 = math.exp %102 : vector<8x32xf32>
    %104 = arith.mulf %103, %7 : vector<8x32xf32>
    %105 = arith.mulf %90, %83 : vector<8x32xf32>
    %106 = arith.mulf %100, %105 : vector<8x32xf32>
    %107 = arith.addf %104, %106 : vector<8x32xf32>
    %108 = arith.mulf %103, %9 : vector<8x32xf32>
    %109 = arith.mulf %100, %83 : vector<8x32xf32>
    %110 = arith.addf %108, %109 : vector<8x32xf32>
    %cst_42 = arith.constant dense<0.000000e+00> : vector<32x32xf32>
    %111 = tpu.matmul %82, %110, %cst_42 {dimension_numbers = #tpu.dot_dimension_numbers<[0], [0], [1], [1], [0, 1, 1, 1], [], []>} : vector<8x32xf32>, vector<8x32xf32>, vector<32x32xf32> -> vector<32x32xf32>
    %112 = math.absf %111 : vector<32x32xf32>
    %cst_43 = arith.constant dense<0xFF800000> : vector<32xf32>
    %113 = vector.multi_reduction <maximumf>, %112, %cst_43 [0] : vector<32x32xf32> to vector<32xf32>
    %114 = vector.shape_cast %113 : vector<32xf32> to vector<1x32xf32>
    %115 = arith.mulf %107, %82 : vector<8x32xf32>
    %116 = arith.mulf %96, %115 : vector<8x32xf32>
    %117 = vector.broadcast %114 : vector<1x32xf32> to vector<8x32xf32>
    %118 = arith.divf %116, %117 : vector<8x32xf32>
    %c0_44 = arith.constant 0 : index
    %c0_45 = arith.constant 0 : index
    %119 = vector.load %arg8[%c0_44, %c0_45] : memref<32x4xf32, #tpu.memory_space<vmem>>, vector<32x4xf32>
    %c0_46 = arith.constant 0 : index
    %c0_47 = arith.constant 0 : index
    %120 = vector.load %arg9[%c0_46, %c0_47] : memref<4x32xf32, #tpu.memory_space<vmem>>, vector<4x32xf32>
    %cst_48 = arith.constant dense<0.000000e+00> : vector<8x4xf32>
    %121 = tpu.matmul %118, %119, %cst_48 {dimension_numbers = #tpu.dot_dimension_numbers<[1], [0], [0], [1], [0, 0, 1, 1], [], []>} : vector<8x32xf32>, vector<32x4xf32>, vector<8x4xf32> -> vector<8x4xf32>
    %cst_49 = arith.constant 1.250000e-01 : f32
    %122 = vector.broadcast %cst_49 : f32 to vector<8x4xf32>
    %123 = arith.mulf %121, %122 : vector<8x4xf32>
    %cst_50 = arith.constant dense<0.000000e+00> : vector<8x32xf32>
    %124 = tpu.matmul %123, %120, %cst_50 {dimension_numbers = #tpu.dot_dimension_numbers<[1], [0], [0], [1], [0, 0, 1, 1], [], []>} : vector<8x4xf32>, vector<4x32xf32>, vector<8x32xf32> -> vector<8x32xf32>
    %125 = arith.subf %118, %124 : vector<8x32xf32>
    %126 = arith.mulf %125, %125 : vector<8x32xf32>
    %cst_51 = arith.constant dense<0.000000e+00> : vector<8x4xf32>
    %127 = tpu.matmul %126, %119, %cst_51 {dimension_numbers = #tpu.dot_dimension_numbers<[1], [0], [0], [1], [0, 0, 1, 1], [], []>} : vector<8x32xf32>, vector<32x4xf32>, vector<8x4xf32> -> vector<8x4xf32>
    %cst_52 = arith.constant 1.250000e-01 : f32
    %128 = vector.broadcast %cst_52 : f32 to vector<8x4xf32>
    %129 = arith.mulf %127, %128 : vector<8x4xf32>
    %cst_53 = arith.constant dense<0.000000e+00> : vector<8x32xf32>
    %130 = tpu.matmul %129, %120, %cst_53 {dimension_numbers = #tpu.dot_dimension_numbers<[1], [0], [0], [1], [0, 0, 1, 1], [], []>} : vector<8x4xf32>, vector<4x32xf32>, vector<8x32xf32> -> vector<8x32xf32>
    %cst_54 = arith.constant 9.99999974E-6 : f32
    %131 = vector.broadcast %cst_54 : f32 to vector<8x32xf32>
    %132 = arith.addf %130, %131 : vector<8x32xf32>
    %133 = math.rsqrt %132 : vector<8x32xf32>
    %134 = arith.mulf %125, %133 : vector<8x32xf32>
    %135 = vector.broadcast %17 : vector<1x32xf32> to vector<8x32xf32>
    %136 = arith.mulf %134, %135 : vector<8x32xf32>
    %137 = vector.broadcast %18 : vector<1x32xf32> to vector<8x32xf32>
    %138 = arith.addf %136, %137 : vector<8x32xf32>
    %139 = arith.addf %138, %81 : vector<8x32xf32>
    %140 = arith.negf %47 : vector<8x32xf32>
    %141 = math.exp %140 : vector<8x32xf32>
    %cst_55 = arith.constant 1.000000e+00 : f32
    %142 = vector.broadcast %cst_55 : f32 to vector<8x32xf32>
    %143 = arith.addf %142, %141 : vector<8x32xf32>
    %144 = arith.divf %142, %143 : vector<8x32xf32>
    %145 = arith.mulf %47, %144 : vector<8x32xf32>
    %146 = arith.mulf %139, %145 : vector<8x32xf32>
    %c0_56 = arith.constant 0 : index
    %c0_57 = arith.constant 0 : index
    %147 = vector.load %arg6[%c0_56, %c0_57] : memref<32x128xf32, #tpu.memory_space<vmem>>, vector<32x128xf32>
    %cst_58 = arith.constant dense<0.000000e+00> : vector<8x128xf32>
    %148 = tpu.matmul %146, %147, %cst_58 {dimension_numbers = #tpu.dot_dimension_numbers<[1], [0], [0], [1], [0, 0, 1, 1], [], []>} : vector<8x32xf32>, vector<32x128xf32>, vector<8x128xf32> -> vector<8x128xf32>
    %149 = vector.broadcast %19 : vector<1x128xf32> to vector<8x128xf32>
    %150 = arith.addf %148, %149 : vector<8x128xf32>
    %151 = arith.addf %150, %4 : vector<8x128xf32>
    %c0_59 = arith.constant 0 : index
    %c0_60 = arith.constant 0 : index
    %c0_61 = arith.constant 0 : index
    %152 = vector.load %arg11[%c0_59, %c0_60, %c0_61] : memref<1x8x128xf32, #tpu.memory_space<vmem>>, vector<1x8x128xf32>
    %153 = vector.shape_cast %152 : vector<1x8x128xf32> to vector<8x128xf32>
    %154 = vector.shape_cast %151 : vector<8x128xf32> to vector<1x8x128xf32>
    tpu.vector_store %arg11[%c0_59, %c0_60, %c0_61], %154 {strides = array<i32>} : memref<1x8x128xf32, #tpu.memory_space<vmem>>, vector<1x8x128xf32>,
    %c0_62 = arith.constant 0 : index
    %c0_63 = arith.constant 0 : index
    %c0_64 = arith.constant 0 : index
    %155 = vector.load %arg13[%c0_62, %c0_63, %c0_64] : memref<3x8x32xf32, #tpu.memory_space<vmem>>, vector<1x8x32xf32>
    %156 = vector.shape_cast %155 : vector<1x8x32xf32> to vector<8x32xf32>
    %157 = vector.shape_cast %107 : vector<8x32xf32> to vector<1x8x32xf32>
    tpu.vector_store %arg13[%c0_62, %c0_63, %c0_64], %157 {strides = array<i32>} : memref<3x8x32xf32, #tpu.memory_space<vmem>>, vector<1x8x32xf32>,
    %c1_65 = arith.constant 1 : index
    %c0_66 = arith.constant 0 : index
    %c0_67 = arith.constant 0 : index
    %158 = vector.load %arg13[%c1_65, %c0_66, %c0_67] : memref<3x8x32xf32, #tpu.memory_space<vmem>>, vector<1x8x32xf32>
    %159 = vector.shape_cast %158 : vector<1x8x32xf32> to vector<8x32xf32>
    %160 = vector.shape_cast %110 : vector<8x32xf32> to vector<1x8x32xf32>
    tpu.vector_store %arg13[%c1_65, %c0_66, %c0_67], %160 {strides = array<i32>} : memref<3x8x32xf32, #tpu.memory_space<vmem>>, vector<1x8x32xf32>,
    %c2_68 = arith.constant 2 : index
    %c0_69 = arith.constant 0 : index
    %c0_70 = arith.constant 0 : index
    %161 = vector.load %arg13[%c2_68, %c0_69, %c0_70] : memref<3x8x32xf32, #tpu.memory_space<vmem>>, vector<1x8x32xf32>
    %162 = vector.shape_cast %161 : vector<1x8x32xf32> to vector<8x32xf32>
    %163 = vector.shape_cast %98 : vector<8x32xf32> to vector<1x8x32xf32>
    tpu.vector_store %arg13[%c2_68, %c0_69, %c0_70], %163 {strides = array<i32>} : memref<3x8x32xf32, #tpu.memory_space<vmem>>, vector<1x8x32xf32>,
    %c0_71 = arith.constant 0 : index
    %c0_72 = arith.constant 0 : index
    %164 = vector.load %arg12[%c0_71, %c0_72] : memref<8x128xf32, #tpu.memory_space<vmem>>, vector<8x32xf32>
    tpu.vector_store %arg12[%c0_71, %c0_72], %118 {strides = array<i32>} : memref<8x128xf32, #tpu.memory_space<vmem>>, vector<8x32xf32>,
    %c0_73 = arith.constant 0 : index
    %c32 = arith.constant 32 : index
    %165 = vector.load %arg12[%c0_73, %c32] : memref<8x128xf32, #tpu.memory_space<vmem>>, vector<8x32xf32>
    tpu.vector_store %arg12[%c0_73, %c32], %107 {strides = array<i32>} : memref<8x128xf32, #tpu.memory_space<vmem>>, vector<8x32xf32>,
    %c0_74 = arith.constant 0 : index
    %c64 = arith.constant 64 : index
    %166 = vector.load %arg12[%c0_74, %c64] : memref<8x128xf32, #tpu.memory_space<vmem>>, vector<8x32xf32>
    tpu.vector_store %arg12[%c0_74, %c64], %110 {strides = array<i32>} : memref<8x128xf32, #tpu.memory_space<vmem>>, vector<8x32xf32>,
    %c0_75 = arith.constant 0 : index
    %c96 = arith.constant 96 : index
    %167 = vector.load %arg12[%c0_75, %c96] : memref<8x128xf32, #tpu.memory_space<vmem>>, vector<8x32xf32>
    tpu.vector_store %arg12[%c0_75, %c96], %98 {strides = array<i32>} : memref<8x128xf32, #tpu.memory_space<vmem>>, vector<8x32xf32>,
    return
  }
  func.func @transform_0(%arg0: i32) -> (i32, i32, i32) {
    %c0_i32 = arith.constant 0 : i32
    %c0_i32_0 = arith.constant 0 : i32
    %c0_i32_1 = arith.constant 0 : i32
    return %arg0, %c0_i32, %c0_i32_0 : i32, i32, i32
  }
  func.func @transform_1(%arg0: i32) -> (i32, i32, i32) {
    %c0_i32 = arith.constant 0 : i32
    %c0_i32_0 = arith.constant 0 : i32
    %c0_i32_1 = arith.constant 0 : i32
    %c0_i32_2 = arith.constant 0 : i32
    return %c0_i32, %c0_i32_0, %c0_i32_1 : i32, i32, i32
  }
  func.func @transform_2(%arg0: i32) -> (i32, i32) {
    %c0_i32 = arith.constant 0 : i32
    %c0_i32_0 = arith.constant 0 : i32
    %c0_i32_1 = arith.constant 0 : i32
    return %c0_i32, %c0_i32_0 : i32, i32
  }
  func.func @transform_3(%arg0: i32) -> (i32, i32) {
    %c0_i32 = arith.constant 0 : i32
    %c0_i32_0 = arith.constant 0 : i32
    %c0_i32_1 = arith.constant 0 : i32
    return %c0_i32, %c0_i32_0 : i32, i32
  }
  func.func @transform_4(%arg0: i32) -> (i32, i32) {
    %c0_i32 = arith.constant 0 : i32
    %c0_i32_0 = arith.constant 0 : i32
    %c0_i32_1 = arith.constant 0 : i32
    return %c0_i32, %c0_i32_0 : i32, i32
  }
  func.func @transform_5(%arg0: i32) -> (i32, i32) {
    %c0_i32 = arith.constant 0 : i32
    %c0_i32_0 = arith.constant 0 : i32
    %c0_i32_1 = arith.constant 0 : i32
    return %c0_i32, %c0_i32_0 : i32, i32
  }
  func.func @transform_6(%arg0: i32) -> (i32, i32) {
    %c0_i32 = arith.constant 0 : i32
    %c0_i32_0 = arith.constant 0 : i32
    %c0_i32_1 = arith.constant 0 : i32
    return %c0_i32, %c0_i32_0 : i32, i32
  }
  func.func @transform_7(%arg0: i32) -> (i32, i32) {
    %c0_i32 = arith.constant 0 : i32
    %c0_i32_0 = arith.constant 0 : i32
    %c0_i32_1 = arith.constant 0 : i32
    return %c0_i32, %c0_i32_0 : i32, i32
  }
  func.func @transform_8(%arg0: i32) -> (i32, i32) {
    %c0_i32 = arith.constant 0 : i32
    %c0_i32_0 = arith.constant 0 : i32
    %c0_i32_1 = arith.constant 0 : i32
    return %c0_i32, %c0_i32_0 : i32, i32
  }
  func.func @transform_9(%arg0: i32) -> i32 {
    %c0_i32 = arith.constant 0 : i32
    %c0_i32_0 = arith.constant 0 : i32
    return %c0_i32 : i32
  }
  func.func @transform_10(%arg0: i32) -> (i32, i32, i32) {
    %c0_i32 = arith.constant 0 : i32
    %c0_i32_0 = arith.constant 0 : i32
    %c0_i32_1 = arith.constant 0 : i32
    return %arg0, %c0_i32, %c0_i32_0 : i32, i32, i32
  }
  func.func @transform_11(%arg0: i32) -> (i32, i32) {
    %c0_i32 = arith.constant 0 : i32
    %c0_i32_0 = arith.constant 0 : i32
    %c0_i32_1 = arith.constant 0 : i32
    return %c0_i32, %c0_i32_0 : i32, i32
  }
}

</mosaic_0001>

<bundles_post_ra>
// kernel: tpu_custom_call.1
= control target key start
LH: loop header
LB: loop body
LE: loop exit
PB: predicated region body
PF: predicated region fallthrough
CT: control target
= control target key end

     0   :  { %s2992_s0 = inlined_call_operand.hbm [shape: f32[12,8,128], index: 0, kind: input, shape index: {}]   ;;  %s2993_s1 = inlined_call_operand.hbm [shape: f32[3,8,32], index: 1, kind: input, shape index: {}]   ;;  %s2994_s2 = inlined_call_operand.hbm [shape: f32[16,256], index: 2, kind: input, shape index: {}]   ;;  %s2995_s3 = inlined_call_operand.hbm [shape: f32[32,640], index: 3, kind: input, shape index: {}]   ;;  %s2996_s4 = inlined_call_operand.hbm [shape: f32[32,256], index: 4, kind: input, shape index: {}]   ;;  %s2997_s5 = inlined_call_operand.hbm [shape: f32[32,128], index: 5, kind: input, shape index: {}]   ;;  %s2998_s6 = inlined_call_operand.vmem [shape: f32[8,640], index: 6, kind: input, shape index: {}]   ;;  %s2999_s7 = inlined_call_operand.vmem [shape: f32[32,4], index: 7, kind: input, shape index: {}]   ;;  %s3000_s8 = inlined_call_operand.vmem [shape: f32[4,32], index: 8, kind: input, shape index: {}]   ;;  %s3001_s9 = inlined_call_operand.vmem [shape: f32[8], index: 9, kind: input, shape index: {}]   ;;  %s3002_s10 = inlined_call_operand.hbm [shape: f32[12,8,128], index: 10, kind: output, shape index: {0}]   ;;  %s3003_s11 = inlined_call_operand.hbm [shape: f32[8,128], index: 11, kind: output, shape index: {1}]  }
   0x1   :  { %3012 = sst [smem:[#allocation26_spill]] %s2993_s1 }
   0x2   :  { %3013 = sst [smem:[#allocation27_spill]] %s2995_s3 }
   0x3   :  { %3014 = sst [smem:[#allocation28_spill]] %s3000_s8 }
   0x4   :  { %3015 = sst [smem:[#allocation29_spill]] %s3002_s10 }
   0x5   :  { %3016 = sst [smem:[#allocation30_spill]] %s3003_s11 }
   0x6   :  { %17 = vsyncpa [#allocation4], 0 }
   0x7   :  { %19 = vsyncpa [#allocation4 + $0x1], 0 }
   0x8   :  { %20 = vsyncpa [#allocation8], 0 }
   0x9   :  { %21 = vsyncpa [#allocation11], 0 }
   0xa   :  { %22 = vsyncpa [#allocation14], 0 }
   0xb   :  { %23 = vsyncpa [#allocation6], 0 }
   0xc   :  { %24 = vsyncpa [#allocation5], 0 }
   0xd   :  { %26 = vsyncpa [#allocation5 + $0x1], 0 }
   0xe   :  { %27 = vsyncpa [#allocation18], 0  ;;  %s2511_s17 = smov 0   ;;  %s2513_s18 = smov 0  }
   0xf   :  { %s2515_s19 = smov 0   ;;  %s2517_s20 = smov 0  }
  0x10 LB: > { %s2426_s21 = smov [#allocation7]   ;;  %s2532_s23 = sadd.s32 4294967295, %s2424_s20   ;;  %s2424_s20 = sphi %s2517_s20, %s3053_s20   ;;  %s2420_s19 = sphi %s2515_s19, %s3052_s19   ;;  %s2416_s18 = sphi %s2513_s18, %s3051_s18   ;;  %s2412_s17 = sphi %s2511_s17, %s3050_s17  }
  0x11   : > { %s312_s22 = sshll.u32 %s2426_s21, 4  ;;  %p1779_p0 = scmp.ge.s32.totalorder %s2424_s20, 1  ;;  %s2538_s22 = int_to_ptr.vmem [resolvable:$true] %s312_s22 }
  0x12   : > { %p3007_p1 = scmp.eq.s32.totalorder %s2532_s23, 0  ;;  %p300_p2 = scmp.lt.s32.totalorder %s2424_s20, 13 }
  0x13   : > { %s2427_s25 = smov [#allocation10]   ;;  %s2428_s28 = smov [#allocation9]  }
  0x14   : > { %p2540_p4 = pnand %p1779_p0, %p300_p2  ;;  %s338_s26 = sshll.u32 %s2427_s25, 4  ;;  %s2552_s26 = int_to_ptr.vmem [resolvable:$true] %s338_s26 }
  0x15   : > { %s2554_s29 = sshll.u32 %s2428_s28, 4  ;;  %s3019_s1 = sld [smem:[#allocation26_spill]]  ;;  %s326_s29 = int_to_ptr.vmem [resolvable:$true] %s2554_s29 }
  0x16   : > { %s3017_s24 = scalar_select %p2540_p4, 1, 0 }
  0x17   : > { %p2007_p5 = pneg %p2540_p4 }
  0x19   : > { %p2548_p6 = pnand %p2007_p5, %p3007_p1 }
  0x1b   : > { %s2127_s13 = scalar_lea.hbm %s3019_s1, 384  ;;  %p2564_p8 = pneg %p2548_p6 }
  0x1c   : > { %p2128_p7 = scmp.ne.s32.totalorder %s3019_s1, %s2127_s13  ;;  %p2134_p11 = scmp.lt.u32.totalorder %s2127_s13, %s3019_s1 }
  0x1e   : > { %p2130_p9 = pnand %p2564_p8, %p2128_p7 }
  0x20   : > { %p2131_p10 = pneg %p2130_p9 }
  0x22   : > { %p2136_p12 = pnand %p2134_p11, %p2131_p10 }
  0x24   : > { %2139 = shalt.err (!%p2136_p12)
}
  0x25   : > { %s2140_s28 = scalar_lea.vmem %s2538_s22, 384  ;;  %p2148_p5 = scmp.lt.s32.totalorder %s2538_s22, %s2538_s22 }
  0x26   : > { %p2141_p13 = scmp.ne.s32.totalorder %s2538_s22, %s2140_s28  ;;  %p2149_p3 = scmp.lt.s32.totalorder %s2140_s28, %s2140_s28 }
  0x28   : > { %p2143_p0 = pnand %p2141_p13, %p2564_p8  ;;  %p2150_p7 = por %p2149_p3, %p2148_p5 }
  0x2a   : > { %p2144_p2 = pneg %p2143_p0 }
  0x2c   : > { %p2151_p9 = pnand %p2150_p7, %p2144_p2 }
  0x2e   : > { %2154 = shalt.err (!%p2151_p9)
}
  0x2f   : > { %s3006_s30 = smov 128   ;;  %s3009_s12 = smov 8  }
  0x30   : > { %2010 = dma.hbm_to_vmem [thread:$0]  (!%p2548_p6), %s3019_s1, 384, %s2538_s22, [#allocation8], %s3006_s30, %s3006_s30, %s3009_s12  }
  0x31   : > { %s3021_s3 = sld [smem:[#allocation27_spill]] }
  0x37   : > { %s2155_s25 = scalar_lea.hbm %s3021_s3, 2560 }
  0x38   : > { %p2156_p3 = scmp.ne.s32.totalorder %s3021_s3, %s2155_s25  ;;  %p2162_p12 = scmp.lt.u32.totalorder %s2155_s25, %s3021_s3 }
  0x3a   : > { %p2158_p10 = pnand %p2156_p3, %p2564_p8 }
  0x3c   : > { %p2159_p11 = pneg %p2158_p10 }
  0x3e   : > { %p2164_p13 = pnand %p2162_p12, %p2159_p11 }
  0x40   : > { %2167 = shalt.err (!%p2164_p13)
}
  0x41   : > { %s2168_s22 = scalar_lea.vmem %s2552_s26, 2560  ;;  %p2176_p7 = scmp.lt.s32.totalorder %s2552_s26, %s2552_s26 }
  0x42   : > { %p2169_p0 = scmp.ne.s32.totalorder %s2552_s26, %s2168_s22  ;;  %p2177_p9 = scmp.lt.s32.totalorder %s2168_s22, %s2168_s22 }
  0x44   : > { %p2171_p2 = pnand %p2169_p0, %p2564_p8  ;;  %p2178_p3 = por %p2177_p9, %p2176_p7 }
  0x46   : > { %p2172_p5 = pneg %p2171_p2 }
  0x48   : > { %p2179_p10 = pnand %p2178_p3, %p2172_p5 }
  0x4a   : > { %2182 = shalt.err (!%p2179_p10)
}
  0x4b   : > { %s2431_s10 = smov 640   ;;  %s2432_s8 = smov 40  }
  0x4c   : > { %2016 = dma.hbm_to_vmem [thread:$0]  (!%p2548_p6), %s3021_s3, 2560, %s2552_s26, [#allocation11], %s2431_s10, %s2431_s10, %s2432_s8  }
  0x4d   : > { %s2183_s21 = scalar_lea.hbm %s2994_s2, 512 }
  0x4e   : > { %p2184_p11 = scmp.ne.s32.totalorder %s2994_s2, %s2183_s21  ;;  %p2190_p0 = scmp.lt.u32.totalorder %s2183_s21, %s2994_s2 }
  0x50   : > { %p2186_p12 = pnand %p2184_p11, %p2564_p8 }
  0x52   : > { %p2187_p13 = pneg %p2186_p12 }
  0x54   : > { %p2192_p2 = pnand %p2190_p0, %p2187_p13 }
  0x56   : > { %2195 = shalt.err (!%p2192_p2)
}
  0x57   : > { %s2196_s11 = scalar_lea.vmem %s326_s29, 512  ;;  %p2204_p3 = scmp.lt.s32.totalorder %s326_s29, %s326_s29 }
  0x58   : > { %p2197_p5 = scmp.ne.s32.totalorder %s326_s29, %s2196_s11  ;;  %p2205_p10 = scmp.lt.s32.totalorder %s2196_s11, %s2196_s11 }
  0x5a   : > { %p2199_p7 = pnand %p2197_p5, %p2564_p8  ;;  %p2206_p1 = por %p2205_p10, %p2204_p3 }
  0x5c   : > { %p2200_p9 = pneg %p2199_p7 }
  0x5e   : > { %p2207_p4 = pnand %p2206_p1, %p2200_p9 }
  0x60   : > { %2210 = shalt.err (!%p2207_p4)
}
  0x61   : > { %s2433_s26 = smov 256   ;;  %s2434_s10 = smov 16  }
  0x62   : > { %2013 = dma.hbm_to_vmem [thread:$0]  (!%p2548_p6), %s2994_s2, 512, %s326_s29, [#allocation8], %s2433_s26, %s2433_s26, %s2434_s10  }
  0x63   : > { %s2435_s13 = smov [#allocation12]   ;;  %s2436_s15 = smov [#allocation13]  }
  0x64   : > { %s351_s14 = sshll.u32 %s2435_s13, 4  ;;  %s364_s21 = sshll.u32 %s2436_s15, 4  ;;  %s352_s14 = int_to_ptr.vmem [resolvable:$true] %s351_s14  ;;  %s365_s21 = int_to_ptr.vmem [resolvable:$true] %s364_s21 }
  0x65   : > { %s2211_s22 = scalar_lea.hbm %s2996_s4, 1024 }
  0x66   : > { %p2212_p1 = scmp.ne.s32.totalorder %s2996_s4, %s2211_s22  ;;  %p2218_p12 = scmp.lt.u32.totalorder %s2211_s22, %s2996_s4 }
  0x68   : > { %p2214_p4 = pnand %p2212_p1, %p2564_p8 }
  0x6a   : > { %p2215_p11 = pneg %p2214_p4 }
  0x6c   : > { %p2220_p13 = pnand %p2218_p12, %p2215_p11 }
  0x6e   : > { %2223 = shalt.err (!%p2220_p13)
}
  0x6f   : > { %s2224_s29 = scalar_lea.vmem %s352_s14, 1024  ;;  %p2232_p7 = scmp.lt.s32.totalorder %s352_s14, %s352_s14 }
  0x70   : > { %p2225_p0 = scmp.ne.s32.totalorder %s352_s14, %s2224_s29  ;;  %p2233_p9 = scmp.lt.s32.totalorder %s2224_s29, %s2224_s29 }
  0x72   : > { %p2227_p2 = pnand %p2225_p0, %p2564_p8  ;;  %p2234_p3 = por %p2233_p9, %p2232_p7 }
  0x74   : > { %p2228_p5 = pneg %p2227_p2 }
  0x76   : > { %p2235_p10 = pnand %p2234_p3, %p2228_p5 }
  0x78   : > { %2238 = shalt.err (!%p2235_p10)
}
  0x79   : > { %2019 = dma.hbm_to_vmem [thread:$0]  (!%p2548_p6), %s2996_s4, 1024, %s352_s14, [#allocation11], %s2433_s26, %s2433_s26, %s2434_s10  }
  0x7a   : > { %s387_s8 = sshll.u32 %s3001_s9, 4  ;;  %s2239_s25 = scalar_lea.hbm %s2997_s5, 512  ;;  %s388_s8 = int_to_ptr.vmem [resolvable:$true] %s387_s8 }
  0x7b   : > { %p2240_p1 = scmp.ne.s32.totalorder %s2997_s5, %s2239_s25  ;;  %p2246_p12 = scmp.lt.u32.totalorder %s2239_s25, %s2997_s5 }
  0x7d   : > { %p2242_p4 = pnand %p2240_p1, %p2564_p8 }
  0x7f   : > { %p2243_p11 = pneg %p2242_p4 }
  0x81   : > { %p2248_p13 = pnand %p2246_p12, %p2243_p11 }
  0x83   : > { %2251 = shalt.err (!%p2248_p13)
}
  0x84   : > { %s2252_s26 = scalar_lea.vmem %s365_s21, 512  ;;  %p2260_p7 = scmp.lt.s32.totalorder %s365_s21, %s365_s21 }
  0x85   : > { %p2253_p0 = scmp.ne.s32.totalorder %s365_s21, %s2252_s26  ;;  %p2261_p9 = scmp.lt.s32.totalorder %s2252_s26, %s2252_s26 }
  0x87   : > { %p2255_p2 = pnand %p2253_p0, %p2564_p8  ;;  %p2262_p3 = por %p2261_p9, %p2260_p7 }
  0x89   : > { %p2256_p5 = pneg %p2255_p2 }
  0x8b   : > { %p2263_p10 = pnand %p2262_p3, %p2256_p5 }
  0x8d   : > { %2266 = shalt.err (!%p2263_p10)
}
  0x8e   : > { %s3022_s10 = smov 8   ;;  %s3023_s14 = smov 128  }
  0x8f   : > { %2022 = dma.hbm_to_vmem [thread:$0]  (!%p2548_p6), %s2997_s5, 512, %s365_s21, [#allocation14], %s3023_s14, %s3023_s14, %s3022_s10  }
  0x90   : > { %s2267_s1 = scalar_lea.vmem %s388_s8, 16  ;;  %p2275_p12 = scmp.lt.s32.totalorder %s388_s8, %s388_s8 }
  0x91   : > { %p2268_p1 = scmp.ne.s32.totalorder %s388_s8, %s2267_s1  ;;  %p2276_p13 = scmp.lt.s32.totalorder %s2267_s1, %s2267_s1 }
  0x93   : > { %p2270_p4 = pnand %p2268_p1, %p2564_p8  ;;  %p2277_p0 = por %p2276_p13, %p2275_p12 }
  0x95   : > { %p2271_p11 = pneg %p2270_p4 }
  0x97   : > { %p2278_p2 = pnand %p2277_p0, %p2271_p11 }
  0x99   : > { %2281 = shalt.err (!%p2278_p2)
}
  0x9a   : > { %s2437_s3 = smov [#allocation15]   ;;  %s1778_s16 = sadd.s32 4294967294, %s2424_s20  }
  0x9b   : > { %2025 = dma.vmem_to_smem (!%p2548_p6), %s388_s8, 16, %s2437_s3, [#allocation6]  }
  0x9c   : > { %s2678_s21 = sadd.s32 1, %s2424_s20   ;;  %s40_s13 = sadd.s32 1, %s2420_s19 }
  0x9d   : > { %s37_s27 = ssub.s32 %s2424_s20, %s2678_s21  ;;  %p47_p5 = scmp.ne.s32.totalorder %s2420_s19, %s2416_s18 }
  0x9e   : > { %p38_p8 = scmp.eq.s32.totalorder %s37_s27, 0  ;;  %p48_p7 = scmp.eq.s32.totalorder %s2424_s20, 0 }
  0x9f   : > { %p53_p9 = scmp.ne.s32.totalorder %s2416_s18, %s2412_s17  ;;  %p3025_p10 = scmp.eq.s32.totalorder %s2532_s23, 0 }
  0xa0   : > { %s2689_s15 = scalar_select %p38_p8, %s2420_s19, %s40_s13  }
  0xa1   : > { %p2691_p3 = por %p48_p7, %p47_p5  ;;  %p2697_p6 = por %p3025_p10, %p53_p9 }
  0xa2   : > { %p3010_p1 = scmp.eq.s32.totalorder %s2532_s23, 11  ;;  %p272_p4 = scmp.eq.s32.totalorder %s1778_s16, 11 }
  0xa3   : > { %p2040_p11 = scmp.lt.s32.totalorder %s2424_s20, 12  ;;  %s398_s28 = sand.u32 1, %s2420_s19  }
  0xa4   : > { %p2706_p12 = por %p3010_p1, %p47_p5  ;;  %p2710_p13 = por %p272_p4, %p53_p9 }
  0xa5   : > { %s1787_s29 = sshll.u32 %s398_s28, 3  ;;  %s1788_s26 = sshll.u32 %s2424_s20, 7 }
  0xa6   : > { %s3027_s22 = scalar_select %p2706_p12, 1, 0 }
  0xa7   : > { %s3028_s11 = scalar_select %p2710_p13, 1, 0 }
  0xa8   : > { %s2718_s12 = scalar_lea.hbm %s2992_s0, %s1788_s26  ;;  %s402_s30 = scalar_lea.vmem [#allocation3], %s1787_s29 }
  0xa9   : > { %s409_s1 = sshll.u32 %s402_s30, 4  ;;  %p2724_p0 = pnand %p2040_p11, %p2691_p3  ;;  %s2720_s1 = int_to_ptr.vmem [resolvable:$true] %s409_s1 }
  0xaa   : > { %s399_s16 = scalar_lea.sflag [#allocation4], %s398_s28  ;;  %s2282_s27 = scalar_lea.hbm %s2718_s12, 128 }
  0xab   : > { %p2283_p2 = scmp.ne.s32.totalorder %s2718_s12, %s2282_s27  ;;  %p2284_p8 = pneg %p2724_p0 }
  0xac   : > { %s2287_s26 = scalar_lea.hbm %s2992_s0, 1536  ;;  %p2288_p9 = scmp.lt.u32.totalorder %s2718_s12, %s2992_s0 }
  0xad   : > { %p2285_p5 = pnand %p2284_p8, %p2283_p2  ;;  %p2289_p3 = scmp.lt.u32.totalorder %s2287_s26, %s2282_s27 }
  0xae   : > { %p2291_p4 = scmp.lt.u32.totalorder %s2282_s27, %s2718_s12 }
  0xaf   : > { %p2286_p7 = pneg %p2285_p5  ;;  %p2290_p10 = por %p2289_p3, %p2288_p9 }
  0xb1   : > { %p2292_p11 = por %p2291_p4, %p2290_p10 }
  0xb3   : > { %p2293_p1 = pnand %p2292_p11, %p2286_p7 }
  0xb5   : > { %2296 = shalt.err (!%p2293_p1)
}
  0xb6   : > { %s2297_s28 = scalar_lea.vmem %s2720_s1, 128  ;;  %s2438_s14 = smov [#allocation3]  }
  0xb7   : > { %p2298_p2 = scmp.ne.s32.totalorder %s2720_s1, %s2297_s28  ;;  %s2302_s30 = sshll.u32 %s2438_s14, 4  ;;  %s2303_s30 = int_to_ptr.vmem [resolvable:$false] %s2302_s30 }
  0xb8   : > { %s2304_s13 = scalar_lea.vmem %s2303_s30, 256  ;;  %p2305_p12 = scmp.lt.s32.totalorder %s2720_s1, %s2303_s30 }
  0xb9   : > { %p2300_p5 = pnand %p2298_p2, %p2284_p8  ;;  %p2306_p9 = scmp.lt.s32.totalorder %s2304_s13, %s2297_s28 }
  0xbb   : > { %p2301_p13 = pneg %p2300_p5  ;;  %p2307_p3 = por %p2306_p9, %p2305_p12 }
  0xbd   : > { %p2308_p10 = pnand %p2307_p3, %p2301_p13 }
  0xbf   : > { %2311 = shalt.err (!%p2308_p10)
}
  0xc0   : > { %2029 = dma.hbm_to_vmem [thread:$0]  (!%p2724_p0), %s2718_s12, 128, %s2720_s1, %s399_s16  }
  0xc1   : > { %p3030_p1 = scmp.ne.s32.totalorder %s3017_s24, 0 }
  0xc2   : > { %s2756_s27 = sand.u32 (!%p3030_p1), 1, %s2416_s18  }
  0xc3   : > { %418 = sbr.rel (%p3030_p1) target bundleno = 2737 (0xab1), region = 60  ;;  %s1790_s29 = sshll.u32 (!%p3030_p1), %s2756_s27, 3 }
  0xc4   : > { %s421_s26 = scalar_lea.sflag (!%p3030_p1), [#allocation4], %s2756_s27  ;;  %s424_s25 = scalar_lea.vmem (!%p3030_p1), [#allocation3], %s1790_s29 }
  0xca   : > { %2383 = dma.done.wait (%p2697_p6), %s421_s26, 128  }
  0xcb   : > { %2385 = vsyncadd (%p2697_p6), %s421_s26, 4294967168  ;;  %p3031_p12 = scmp.eq.s32.totalorder %s2532_s23, 0 }
  0xcd   : > { %2387 = dma.done.wait (%p3031_p12), [#allocation8], 896   ;;  %p3032_p13 = pmov %p3031_p12 }
  0xce   : > { %p3033_p0 = pmov %p3031_p12 }
  0xcf   : > { %2389 = vsyncadd (%p3032_p13), [#allocation8], 4294966400 }
  0xd0   : > { %2391 = dma.done.wait (%p3033_p0), [#allocation11], 3584   ;;  %p3034_p8 = pmov %p3033_p0 }
  0xd1   : > { %p3035_p7 = pmov %p3033_p0 }
  0xd2   : > { %2393 = vsyncadd (%p3034_p8), [#allocation11], 4294963712 }
  0xd3   : > { %2395 = dma.done.wait (%p3035_p7), [#allocation14], 512   ;;  %p3036_p4 = pmov %p3033_p0 }
  0xd4   : > { %p3037_p6 = pmov %p3033_p0 }
  0xd5   : > { %2397 = vsyncadd (%p3036_p4), [#allocation14], 4294966784 }
  0xd6   : > { %2399 = dma.done.wait (%p3037_p6), [#allocation6], 16   ;;  %p3038_p11 = pmov %p3033_p0 }
  0xd8   : > { %2401 = vsyncadd (%p3038_p11), [#allocation6], 4294967280 }
  0xd9   : > { %453 = sfence }
  0xda   : > { %s2780_s24 = scalar_lea.vmem [#allocation16], %s1790_s29  ;;  %p3039_p2 = scmp.ne.s32.totalorder %s2532_s23, 0 }
  0xdb   : > { %v492_v0 = vld [vmem:[#allocation7] sm:$0xff] (!%p3039_p2)  ;;  %vm495_vm0 = vcmask (!%p3039_p2), 261120   ;;  %v493_v1 = vld [vmem:[#allocation7 + $0x8] sm:$0xff] (!%p3039_p2)  ;;  %v494_v2 = vld [vmem:[#allocation7 + $0x10] sm:$0xff] (!%p3039_p2) }
  0xdc   : > { %491 = sbr.rel (%p3039_p2) target bundleno = 227 (0xe3), region = 92  ;;  %496 = vst.msk [vmem:[#allocation2] sm:$0xff] (!%p3039_p2), %vm495_vm0, %v492_v0  ;;  %497 = vst.msk [vmem:[#allocation2 + $0x8] sm:$0xff] (!%p3039_p2), %vm495_vm0, %v493_v1 }
  0xdd   : > { %498 = vst.msk [vmem:[#allocation2 + $0x10] sm:$0xff] (!%p3039_p2), %vm495_vm0, %v494_v2 }
  0xe3 PF: > { %v2784_v3 = vld [vmem:[%s424_s25] sm:$0xff]  ;;  %vm518_vm1 = vcmask 130048   ;;  %v536_v10 = vld [vmem:[#allocation9 + $0x8] sm:$0xff]  ;;  %v537_v14 = vld [vmem:[#allocation9 + $0x10] sm:$0xff]  ;;  %v2439_v15 = vmov 0.0   ;;  %v540_v26 = vlaneseq  ;;  %s2440_s28 = smov 8  }
  0xe4   : > { %v519_v4 = vsel %vm518_vm1, %v2784_v3, 0.0  ;;  %v538_v11 = vld [vmem:[#allocation9 + $0x18] sm:$0xff]  ;;  %v535_v12 = vld [vmem:[#allocation9] sm:$0xff]  ;;  %617 = vmatprep.mubr.f32.mxu0 %v2439_v15  ;;  %781 = vmatprep.mubr.f32.mxu1 %v2439_v15  ;;  %s1804_s14 = sld [smem:[#allocation15 + $0x1]]  ;;  %s1805_s30 = sld [smem:[#allocation15 + $0x2]]  ;;  %vm633_vm2 = vcmask 64512  }
  0xe5   : > { %520 = vadd.xlane.f32.xlu0 %v519_v4  ;;  %v1923_v13 = vpack.c.bf16 %v538_v11, %v536_v10  ;;  %v1925_v16 = vpack.c.bf16 %v537_v14, %v535_v12  ;;  %v505_v21 = vld [vmem:[%s2998_s6] ss:$0 sm:$0xff]  ;;  %v506_v23 = vld [vmem:[%s2998_s6 + $0x1] ss:$0 sm:$0xff]  ;;  %v2800_v27 = vshrl.u32 %v540_v26, 7  ;;  %s624_s13 = sld [smem:[#allocation15]] }
  0xe6   : > { %v2808_v29 = vld [vmem:[%s2998_s6 + $0x2] ss:$8 sm:$0x3]  ;;  %s2441_s29 = smov 122   ;;  %s2442_s26 = smov 121   ;;  %v673_v43 = vld [vmem:[#allocation10 + $0x30] sm:$0xff] }
  0xe7   : > { %1924 = vmatprep.subr.bf16.mxu0 %v1923_v13  ;;  %v2803_v28 = vsub.s32 0, %v2800_v27  ;;  %s2443_s25 = smov 123   ;;  %v668_v42 = vld [vmem:[#allocation10 + $0x8] sm:$0xff]  ;;  %v670_v44 = vld [vmem:[#allocation10 + $0x18] sm:$0xff]  ;;  %v675_v46 = vld [vmem:[#allocation10 + $0x40] sm:$0xff]  ;;  %s1806_s8 = sld [smem:[#allocation15 + $0x3]] }
  0xe8   : > { %1926 = vmatpush1.bf16.msra.mxu0 %v1925_v16  ;;  %v1927_v45 = vpack.c.bf16 %v673_v43, %v668_v42  ;;  %v667_v47 = vld [vmem:[#allocation10] sm:$0xff]  ;;  %v672_v48 = vld [vmem:[#allocation10 + $0x28] sm:$0xff]  ;;  %v1935_v49 = vpack.c.bf16 %v675_v46, %v670_v44  ;;  %v669_v51 = vld [vmem:[#allocation10 + $0x10] sm:$0xff]  ;;  %s1807_s12 = sld [smem:[#allocation15 + $0x4]]  ;;  %vm713_vm3 = vcmask 261120   ;;  %vm2445_vm4 = vmmov 0  }
  0xe9   : > { %v543_v30 = vrot.slane %v2808_v29, %v2803_v28  ;;  %v1929_v50 = vpack.c.bf16 %v672_v48, %v667_v47  ;;  %v674_v52 = vld [vmem:[#allocation10 + $0x38] sm:$0xff]  ;;  %v683_v55 = vld [vmem:[#allocation10 + $0x80] sm:$0xff]  ;;  %v680_v56 = vld [vmem:[#allocation10 + $0x68] sm:$0xff]  ;;  %v2841_v46 = vsub.s32 1, %v2800_v27  ;;  %vm1275_vm5 = vcmask 1043456   ;;  %p3041_p9 = scmp.eq.s32.totalorder %s2532_s23, 11 }
  0xea   : > { %v639_v34 = vstv %s1805_s30  ;;  %v646_v35 = vstv %s1804_s14  ;;  %1928 = vmatprep.subr.bf16.mxu1 %v1927_v45  ;;  %v1937_v53 = vpack.c.bf16 %v674_v52, %v669_v51  ;;  %1936 = vmatprep.subr.bf16.mxu0 %v1935_v49  ;;  %v678_v54 = vld [vmem:[#allocation10 + $0x58] sm:$0xff]  ;;  %v685_v58 = vld [vmem:[#allocation10 + $0x90] sm:$0xff]  ;;  %v679_v63 = vld [vmem:[#allocation10 + $0x60] sm:$0xff]  ;;  %v698_v49 = vsub.s32 2, %v2800_v27  ;;  %s2446_s30 = smov 32  }
  0xeb   : > { %v653_v40 = vstv %s624_s13  ;;  %1930 = vmatpush1.bf16.msra.mxu1 %v1929_v50  ;;  %v1931_v57 = vpack.c.bf16 %v683_v55, %v678_v54  ;;  %v677_v59 = vld [vmem:[#allocation10 + $0x50] sm:$0xff]  ;;  %v682_v60 = vld [vmem:[#allocation10 + $0x78] sm:$0xff]  ;;  %v1939_v61 = vpack.c.bf16 %v685_v58, %v680_v56  ;;  %v684_v0 = vld [vmem:[#allocation10 + $0x88] sm:$0xff]  ;;  %v706_v52 = vsub.s32 4, %v2800_v27  ;;  %s2447_s13 = smov 64  }
  0xec   : > { %v1933_v62 = vpack.c.bf16 %v682_v60, %v677_v59  ;;  %v1941_v1 = vpack.c.bf16 %v684_v0, %v679_v63  ;;  %v930_v2 = vld [vmem:[#allocation12 + $0x8] sm:$0xff]  ;;  %v932_v4 = vld [vmem:[#allocation12 + $0x18] sm:$0xff]  ;;  %v1801_v44 = vld [vmem:[%s2998_s6 + $0x3] ss:$8 sm:$0x10]  ;;  %v702_v55 = vsub.s32 3, %v2800_v27 }
  0xed   : > { %1932 = vmatprep.subr.bf16.mxu1 %v1931_v57  ;;  %v936_v26 = vld [vmem:[#allocation12 + $0x38] sm:$0xff]  ;;  %v1802_v54 = vld [vmem:[%s2998_s6 + $0x4] ss:$8 sm:$0x3]  ;;  %vm1598_vm6 = vcmask 523520   ;;  %vm1604_vm7 = vcmask 785920  }
  0xee   : > { %v1800_v43 = vld [vmem:[%s2998_s6 + $0x3] ss:$8 sm:$0xf]  ;;  %v941_v58 = vrot.slane %v1802_v54, %v2803_v28  ;;  %v945_v59 = vrot.slane %v1802_v54, %v2841_v46  ;;  %vm1610_vm8 = vcmask 1048320   ;;  %vm1271_vm9 = vcmask 31744  }
  0xef   : > { %1934 = vmatpush1.bf16.msra.mxu1 %v1933_v62  ;;  %v2838_v45 = vor.u32 %v1801_v44, %v1800_v43  ;;  %v1194_v43 = vld [vmem:[%s2999_s7 + $0x10] sm:$0xff] }
  0xf1   : > { %v695_v47 = vrot.slane %v2838_v45, %v2841_v46  ;;  %v699_v56 = vrot.slane %v2838_v45, %v698_v49  ;;  %v707_v57 = vrot.slane %v2838_v45, %v706_v52  ;;  %v703_v60 = vrot.slane %v2838_v45, %v702_v55 }
 0x172   : > { %v521_v5 = vpop.xlane.xlu0 %520 }
 0x173   : > { %v523_v6 = vmul.f32 0.0625, %v521_v5  ;;  %v1949_v5 = vpack.c.bf16 %v932_v4, %v930_v2 }
 0x175   : > { %v524_v7 = vsub.f32 %v2784_v3, %v523_v6  ;;  %v2444_v6 = vmov 0.0|0.0  }
 0x176   : > { %1943 = vmatprep.subr.bf16.mxu1 %v2444_v6 }
 0x177   : > { %v525_v8 = vmul.f32 %v524_v7, %v524_v7 }
 0x179   : > { %v526_v9 = vsel %vm518_vm1, %v525_v8, 0.0 }
 0x17a   : > { %527 = vadd.xlane.f32.xlu0 %v526_v9  ;;  %v637_v9 = vstv %s1807_s12 }
 0x207   : > { %v528_v17 = vpop.xlane.xlu0 %527 }
 0x208   : > { %v529_v18 = vmul.f32 0.0625, %v528_v17 }
 0x20a   : > { %v530_v19 = vadd.f32 1e-05, %v529_v18 }
 0x20c   : > { %2105 = vrsqrt.f32 %v530_v19 }
 0x216   : > { %v2106_v20 = vpop.eup %2105 }
 0x217   : > { %v532_v22 = vmul.f32 %v2106_v20, %v524_v7  ;;  %v635_v7 = vstv %s1806_s8  ;;  %s2449_s8 = smov [#allocation17]  }
 0x218   : > { %s1637_s12 = sshll.u32 %s2449_s8, 4  ;;  %s1638_s12 = int_to_ptr.vmem [resolvable:$true] %s1637_s12 }
 0x219   : > { %v533_v24 = vmul.f32 %v532_v22, %v505_v21  ;;  %v671_v21 = vld [vmem:[#allocation10 + $0x20] sm:$0xff]  ;;  %v676_v22 = vld [vmem:[#allocation10 + $0x48] sm:$0xff]  ;;  %s2312_s1 = scalar_lea.vmem %s1638_s12, 128  ;;  %p2319_p1 = scmp.lt.s32.totalorder %s1638_s12, %s1638_s12 }
 0x21a   : > { %p2313_p5 = scmp.ne.s32.totalorder %s1638_s12, %s2312_s1  ;;  %p2320_p12 = scmp.lt.s32.totalorder %s2312_s1, %s2312_s1 }
 0x21b   : > { %v534_v25 = vadd.f32 %v533_v24, %v506_v23  ;;  %v929_v23 = vld [vmem:[#allocation12] sm:$0xff]  ;;  %v931_v24 = vld [vmem:[#allocation12 + $0x10] sm:$0xff] }
 0x21c   : > { %p2314_p3 = pnand %p2313_p5, %p3041_p9  ;;  %p2321_p13 = por %p2320_p12, %p2319_p1 }
 0x21d   : > { %1803 = vmatmul.mubr.msk.f32.vlgmr.msra.gmra.mrb[0].mxu0 %vm518_vm1, %v534_v25  ;;  %v934_v25 = vld [vmem:[#allocation12 + $0x28] sm:$0xff] }
 0x21e   : > { %852 = vmatprep.mubr.f32.mxu0 %v2439_v15  ;;  %1938 = vmatpush1.bf16.msra.mxu0 %v1937_v53  ;;  %p2315_p10 = pneg %p2314_p3 }
 0x21f   : > { %1940 = vmatprep.subr.bf16.mxu0 %v1939_v61  ;;  %v504_v61 = vld [vmem:[#allocation2 + $0x10] sm:$0xff] }
 0x220   : > { %p2322_p0 = pnand %p2321_p13, %p2315_p10 }
 0x222   : > { %1942 = vmatpush1.bf16.msra.mxu0 %v1941_v1 }
 0x223   : > { %1950 = vmatprep.subr.bf16.mxu0 %v1949_v5 }
 0x2f0   : > { %v619_v31 = vpop.f32.mrb[0].mxu0 }
 0x2f1   : > { %v2812_v32 = vadd.f32 %v619_v31, %v543_v30  ;;  %v2814_v33 = vpop.f32.mrb[1].mxu0  ;;  %v1944_v31 = vpack.c.bf16 %v676_v22, %v671_v21 }
 0x2f3   : > { %630 = vrot.lane.b32.xlu1 %v2812_v32, %s2440_s28  ;;  %v636_v8 = vmul.f32 %v635_v7, %v2812_v32 }
 0x2f5   : > { %v638_v10 = vadd.f32 %v637_v9, %v636_v8 }
 0x365   : > { %v631_v36 = vpop.permute.xlu1 %630 }
 0x366   : > { %v634_v37 = vsel %vm633_vm2, 0.0, %v631_v36 }
 0x367   : > { %v640_v38 = vmul.f32 %v639_v34, %v634_v37  ;;  %v647_v39 = vmul.f32 %v646_v35, %v634_v37  ;;  %v654_v41 = vmul.f32 %v653_v40, %v634_v37  ;;  %v1951_v34 = vpack.c.bf16 %v931_v24, %v929_v23  ;;  %v681_v35 = vld [vmem:[#allocation10 + $0x70] sm:$0xff] }
 0x368   : > { %v1953_v37 = vpack.c.bf16 %v936_v26, %v934_v25  ;;  %v935_v40 = vld [vmem:[#allocation12 + $0x30] sm:$0xff] }
 0x369   : > { %649 = vrot.lane.b32.xlu0 %v647_v39, %s2441_s29  ;;  %642 = vrot.lane.b32.xlu1 %v640_v38, %s2442_s26  ;;  %v686_v38 = vld [vmem:[#allocation10 + $0x98] sm:$0xff]  ;;  %v933_v39 = vld [vmem:[#allocation12 + $0x20] sm:$0xff]  ;;  %s2448_s29 = smov 96  }
 0x36a   : > { %v1955_v42 = vpack.c.bf16 %v935_v40, %v933_v39 }
 0x36d   : > { %656 = vrot.lane.b32.xlu1 %v654_v41, %s2443_s25  ;;  %v1947_v41 = vpack.c.bf16 %v686_v38, %v681_v35 }
 0x3db   : > { %v643_v11 = vpop.permute.xlu1 %642  ;;  %v650_v13 = vpop.permute.xlu0 %649 }
 0x3dc   : > { %v645_v12 = vadd.f32 %v643_v11, %v638_v10 }
 0x3de   : > { %v652_v14 = vadd.f32 %v650_v13, %v645_v12 }
 0x3df   : > { %v657_v16 = vpop.permute.xlu1 %656 }
 0x3e0   : > { %v659_v17 = vadd.f32 %v657_v16, %v652_v14 }
 0x3e2   : > { %v1808_v18 = vmul.f32 -1.442695, %v659_v17 }
 0x3e4   : > { %2107 = vpow2.f32 %v1808_v18 }
 0x3ee   : > { %v2108_v19 = vpop.eup %2107 }
 0x3ef   : > { %v663_v20 = vadd.f32 1.0, %v2108_v19  ;;  %v502_v19 = vld [vmem:[#allocation2 + $0x8] sm:$0xff] }
 0x3f1   : > { %2109 = vrcp.f32 %v663_v20  ;;  %v500_v20 = vld [vmem:[#allocation2] sm:$0xff] }
 0x3fb   : > { %v2110_v30 = vpop.eup %2109 }
 0x3fc   : > { %v666_v36 = vmul.f32 %v2110_v30, %v659_v17 }
 0x3fe   : > { %1809 = vmatmul.mubr.msk.f32.vlgmr.msra.gmra.mrb[0].mxu1 %vm713_vm3, %v666_v36  ;;  %1810 = vmatmul.mubr.msk.f32.vlgmr.msra.gmra.mrb[2].mxu0 %vm713_vm3, %v666_v36 }
 0x3ff   : > { %1945 = vmatpush3.bf16.msra.mxu1 %v1944_v31  ;;  %1952 = vmatpush1.bf16.msra.mxu0 %v1951_v34 }
 0x400   : > { %1946 = vmatprep.subr.bf16.mxu1 %v2444_v6  ;;  %1954 = vmatprep.subr.bf16.mxu0 %v1953_v37 }
 0x401   : > { %1869 = vmatprep.mubr.msk.f32.mxu1 %vm2445_vm4, %v2439_v15  ;;  %1014 = vmatprep.mubr.f32.mxu0 %v2439_v15 }
 0x403   : > { %1948 = vmatpush3.bf16.msra.mxu1 %v1947_v41  ;;  %1956 = vmatpush1.bf16.msra.mxu0 %v1955_v42  ;;  %v1192_v41 = vld [vmem:[%s2999_s7] sm:$0xff]  ;;  %v1193_v42 = vld [vmem:[%s2999_s7 + $0x8] sm:$0xff] }
 0x404   : > { %1957 = vmatprep.subr.bf16.mxu0 %v2444_v6  ;;  %v1958_v44 = vpack.c.bf16 %v1193_v42, %v1192_v41 }
 0x406   : > { %1870 = vmatmul.mubr.msk.f32.vlgmr.msra.gmra.mrb[2].mxu1 %vm713_vm3, %v666_v36  ;;  %1812 = vmatmul.mubr.msk.f32.vlgmr.msra.gmra.mrb[4].mxu0 %vm713_vm3, %v2812_v32 }
 0x407   : > { %1888 = vmatprep.mubr.msk.f32.mxu0 %vm2445_vm4, %v2439_v15  ;;  %1959 = vmatpush3.bf16.msra.mxu0 %v1958_v44 }
 0x408   : > { %1960 = vmatprep.subr.bf16.mxu0 %v2444_v6 }
 0x4d1   : > { %v2845_v32 = vpop.f32.mrb[0].mxu1  ;;  %v854_v48 = vpop.f32.mrb[2].mxu0 }
 0x4d2   : > { %v785_v50 = vpop.f32.mrb[1].mxu1  ;;  %v856_v51 = vpop.f32.mrb[3].mxu0  ;;  %v855_v0 = vadd.f32 %v854_v48, %v699_v56 }
 0x4d3   : > { %v786_v53 = vadd.f32 %v785_v50, %v695_v47  ;;  %v857_v7 = vadd.f32 %v856_v51, %v703_v60  ;;  %v1195_v47 = vld [vmem:[%s2999_s7 + $0x18] sm:$0xff] }
 0x4d4   : > { %v1961_v48 = vpack.c.bf16 %v1195_v47, %v1194_v43  ;;  %v691_v43 = vrot.slane %v2838_v45, %v2803_v28 }
 0x4d5   : > { %1042 = vxpose.xlu1.b32.start.end [1/1] (short) (narrow) %v786_v53, 32 }
 0x4d6   : > { %1962 = vmatpush3.bf16.msra.mxu0 %v1961_v48  ;;  %v784_v47 = vadd.f32 %v2845_v32, %v691_v43 }
 0x4d7   : > { %1963 = vmatprep.subr.bf16.mxu0 %v2444_v6 }
 0x4d9   : > { %v925_v62 = vpop.f32.mrb[2].mxu1  ;;  %v1016_v63 = vpop.f32.mrb[4].mxu0 }
 0x4da   : > { %v926_v1 = vadd.f32 %v925_v62, %v707_v57  ;;  %v1017_v2 = vadd.f32 %v1016_v63, %v941_v58  ;;  %v1871_v4 = vpop.f32.mrb[3].mxu1  ;;  %v1018_v5 = vpop.f32.mrb[5].mxu0 }
 0x4db   : > { %v1019_v27 = vadd.f32 %v1018_v5, %v945_v59 }
 0x4dc   : > { %v1027_v8 = vadd.f32 %v926_v1, %v504_v61  ;;  %v1036_v9 = vmul.f32 %v1017_v2, %v855_v0 }
 0x4dd   : > { %v1813_v10 = vmul.f32 -1.442695, %v1019_v27 }
 0x4de   : > { %v1028_v11 = vmax.f32 %v1027_v8, %v857_v7 }
 0x4df   : > { %2111 = vpow2.f32 %v1813_v10 }
 0x4e0   : > { %v1029_v12 = vsub.f32 %v857_v7, %v1028_v11  ;;  %v1032_v13 = vsub.f32 %v1027_v8, %v1028_v11  ;;  %1592 = vst.msk [vmem:[#allocation2 + $0x10] sm:$0xff] %vm713_vm3, %v1028_v11 }
 0x4e2   : > { %v1030_v14 = vmul.f32 1.442695, %v1029_v12  ;;  %v1033_v16 = vmul.f32 1.442695, %v1032_v13 }
 0x4e4   : > { %2113 = vpow2.f32 %v1030_v14 }
 0x4e5   : > { %2115 = vpow2.f32 %v1033_v16 }
 0x4e9   : > { %v2112_v17 = vpop.eup %2111 }
 0x4ea   : > { %v1024_v18 = vadd.f32 1.0, %v2112_v17 }
 0x4ec   : > { %2117 = vrcp.f32 %v1024_v18 }
 0x4ee   : > { %v2114_v21 = vpop.eup %2113 }
 0x4ef   : > { %v2116_v22 = vpop.eup %2115  ;;  %v1037_v23 = vmul.f32 %v2114_v21, %v1036_v9  ;;  %v1040_v24 = vmul.f32 %v2114_v21, %v855_v0 }
 0x4f0   : > { %v1039_v25 = vmul.f32 %v2116_v22, %v502_v19  ;;  %v1035_v26 = vmul.f32 %v2116_v22, %v500_v20 }
 0x4f2   : > { %v1041_v30 = vadd.f32 %v1040_v24, %v1039_v25  ;;  %v1038_v31 = vadd.f32 %v1037_v23, %v1035_v26  ;;  %v1511_v24 = vld [vmem:[#allocation13] sm:$0xff]  ;;  %v1512_v25 = vld [vmem:[#allocation13 + $0x8] sm:$0xff]  ;;  %v1513_v26 = vld [vmem:[#allocation13 + $0x10] sm:$0xff] }
 0x4f4   : > { %1872 = vmatprep.subr.mxu1 %v1041_v30  ;;  %1591 = vst.msk [vmem:[#allocation2 + $0x8] sm:$0xff] %vm713_vm3, %v1041_v30  ;;  %1595 = vrot.lane.b32.xlu0 %v1038_v31, %s2446_s30  ;;  %v1188_v34 = vmul.f32 %v1038_v31, %v786_v53  ;;  %1590 = vst.msk [vmem:[#allocation2] sm:$0xff] %vm713_vm3, %v1038_v31  ;;  %s3040_s30 = sld [smem:[#allocation28_spill]]  ;;  %v1514_v31 = vld [vmem:[#allocation13 + $0x18] sm:$0xff] }
 0x4f5   : > { %1873 = vmatpush3.msra.mxu1 %v1041_v30 }
 0x4f6   : > { %v2118_v35 = vpop.eup %2117  ;;  %1891 = vmatprep.subr.mxu1 %v2439_v15 }
 0x4f7   : > { %v1189_v36 = vmul.f32 %v2118_v35, %v1188_v34  ;;  %v1973_v34 = vpack.c.bf16 %v1514_v31, %v1513_v26  ;;  %v547_v35 = vrot.slane %v2808_v29, %v2841_v46 }
 0x4f8   : > { %1601 = vrot.lane.b32.xlu0 %v1041_v30, %s2447_s13  ;;  %v1970_v30 = vpack.c.bf16 %v1512_v25, %v1511_v24 }
 0x4fa   : > { %v1196_v49 = vld [vmem:[%s3040_s30] sm:$0xf] }
 0x4fc   : > { %1607 = vrot.lane.b32.xlu0 %v1028_v11, %s2448_s29 }
 0x555   : > { %v1058_v37 = vpop.trf.xlu1 }
 0x556   : > { %1874 = vmatprep.mubr.msk.f32.mxu1 %vm633_vm2, %v1058_v37 }
 0x559   : > { %v1059_v38 = vpop.trf.xlu1 }
 0x55a   : > { %1875 = vmatmul.mubr.msk.f32.vlgmr.msra.gmra.mrb[4].mxu1 %vm633_vm2, %v1059_v38 }
 0x55b   : > { %1892 = vmatpush3.msk.msra.mxu1 %vm1275_vm5, %v1196_v49 }
 0x55c   : > { %1907 = vmatprep.subr.mxu1 %v2439_v15 }
 0x55d   : > { %v1060_v39 = vpop.trf.xlu1 }
 0x55e   : > { %1877 = vmatprep.mubr.msk.f32.mxu1 %vm633_vm2, %v1060_v39 }
 0x561   : > { %v1061_v40 = vpop.trf.xlu1 }
 0x562   : > { %1878 = vmatmul.mubr.msk.f32.gmra.mrb[6].mxu1 %vm633_vm2, %v1061_v40 }
 0x563   : > { %1893 = vmatprep.mubr.msk.f32.mxu1 %vm2445_vm4, %v2439_v15 }
 0x566   : > { %v1596_v8 = vpop.permute.xlu0 %1595 }
 0x56a   : > { %v1602_v9 = vpop.permute.xlu0 %1601 }
 0x56e   : > { %v1608_v12 = vpop.permute.xlu0 %1607 }
 0x62d   : > { %v1876_v50 = vpop.f32.mrb[4].mxu1 }
 0x62e   : > { %v1172_v51 = vand.u32 2147483647, %v1876_v50  ;;  %v1152_v52 = vpop.f32.mrb[5].mxu1 }
 0x62f   : > { %v1171_v53 = vand.u32 2147483647, %v1152_v52 }
 0x630   : > { %v1176_v54 = vsel %vm713_vm3, %v1172_v51, -inf }
 0x631   : > { %v1175_v55 = vsel %vm713_vm3, %v1171_v53, -inf }
 0x632   : > { %v1179_v56 = vmax.f32 %v1175_v55, %v1176_v54 }
 0x635   : > { %v1879_v57 = vpop.f32.mrb[6].mxu1 }
 0x636   : > { %v1174_v58 = vand.u32 2147483647, %v1879_v57  ;;  %v1162_v59 = vpop.f32.mrb[7].mxu1 }
 0x637   : > { %v1173_v60 = vand.u32 2147483647, %v1162_v59 }
 0x638   : > { %v1178_v61 = vsel %vm713_vm3, %v1174_v58, -inf }
 0x639   : > { %v1177_v62 = vsel %vm713_vm3, %v1173_v60, -inf }
 0x63a   : > { %v1180_v63 = vmax.f32 %v1177_v62, %v1178_v61 }
 0x63c   : > { %v1181_v0 = vmax.f32 %v1179_v56, %v1180_v63 }
 0x63e   : > { %v1182_v1 = vrot.slane %v1181_v0, 4 }
 0x640   : > { %v1183_v2 = vmax.f32 %v1181_v0, %v1182_v1 }
 0x642   : > { %v1184_v4 = vrot.slane %v1183_v2, 2 }
 0x644   : > { %v1185_v5 = vmax.f32 %v1183_v2, %v1184_v4 }
 0x646   : > { %v1186_v27 = vrot.slane %v1185_v5, 1 }
 0x648   : > { %v1187_v7 = vmax.f32 %v1185_v5, %v1186_v27 }
 0x64a   : > { %2119 = vrcp.f32 %v1187_v7 }
 0x654   : > { %v2120_v10 = vpop.eup %2119 }
 0x655   : > { %v1191_v11 = vmul.f32 %v2120_v10, %v1189_v36  ;;  %v622_v36 = vadd.f32 %v2814_v33, %v547_v35  ;;  %v516_v33 = vld [vmem:[%s2998_s6 + $0x6] ss:$0 sm:$0xff] }
 0x657   : > { %1889 = vmatmul.mubr.msk.f32.vlgmr.msra.gmra.mrb[6].mxu0 %vm713_vm3, %v1191_v11  ;;  %1593 = vst.msk [vmem:[#allocation17] sm:$0xff] %vm713_vm3, %v1191_v11  ;;  %v1824_v37 = vmul.f32 -1.442695, %v622_v36 }
 0x658   : > { %1965 = vmatpush3.bf16.msra.mxu0 %v1958_v44  ;;  %1904 = vmatprep.mubr.msk.f32.mxu0 %vm2445_vm4, %v2439_v15  ;;  %1599 = vst.msk [vmem:[#allocation17] sm:$0xff] %vm1598_vm6, %v1596_v8 }
 0x659   : > { %1966 = vmatprep.subr.bf16.mxu0 %v2444_v6  ;;  %1605 = vst.msk [vmem:[#allocation17] sm:$0xff] %vm1604_vm7, %v1602_v9  ;;  %2121 = vpow2.f32 %v1824_v37 }
 0x65a   : > { %1611 = vst.msk [vmem:[#allocation17] sm:$0xff] %vm1610_vm8, %v1608_v12 }
 0x65c   : > { %1968 = vmatpush3.bf16.msra.mxu0 %v1961_v48 }
 0x663   : > { %v2122_v38 = vpop.eup %2121 }
 0x664   : > { %v1506_v41 = vadd.f32 1.0, %v2122_v38 }
 0x72a   : > { %v1266_v13 = vpop.f32.mrb[6].mxu0 }
 0x72b   : > { %v1270_v14 = vmul.f32 0.125, %v1266_v13  ;;  %v1890_v16 = vpop.f32.mrb[7].mxu0 }
 0x72d   : > { %1894 = vmatmul.mubr.msk.f32.vlgmr.msra.gmra.mrb[8].mxu1 %vm1271_vm9, %v1270_v14 }
 0x72e   : > { %1908 = vmatpush3.msk.msra.mxu1 %vm1275_vm5, %v1196_v49  ;;  %1909 = vmatprep.mubr.msk.f32.mxu1 %vm2445_vm4, %v2439_v15 }
 0x72f   : > { %1969 = vmatprep.subr.bf16.mxu1 %v2444_v6 }
 0x800   : > { %v1345_v17 = vpop.f32.mrb[8].mxu1 }
 0x801   : > { %v1349_v18 = vsub.f32 %v1191_v11, %v1345_v17  ;;  %v1895_v19 = vpop.f32.mrb[9].mxu1 }
 0x803   : > { %v1350_v20 = vmul.f32 %v1349_v18, %v1349_v18 }
 0x805   : > { %1905 = vmatmul.mubr.msk.f32.vlgmr.msra.gmra.mrb[8].mxu0 %vm713_vm3, %v1350_v20 }
 0x8d8   : > { %v1420_v21 = vpop.f32.mrb[8].mxu0 }
 0x8d9   : > { %v1424_v22 = vmul.f32 0.125, %v1420_v21  ;;  %v1906_v23 = vpop.f32.mrb[9].mxu0 }
 0x8db   : > { %1910 = vmatmul.mubr.msk.f32.vlgmr.msra.gmra.mrb[10].mxu1 %vm1271_vm9, %v1424_v22 }
 0x8dc   : > { %1920 = vmatprep.mubr.msk.f32.mxu1 %vm2445_vm4, %v2439_v15  ;;  %1971 = vmatpush3.bf16.msra.mxu1 %v1970_v30 }
 0x8dd   : > { %1972 = vmatprep.subr.bf16.mxu1 %v2444_v6  ;;  %v515_v6 = vld [vmem:[%s2998_s6 + $0x5] ss:$0 sm:$0xff] }
 0x8e0   : > { %1974 = vmatpush3.bf16.msra.mxu1 %v1973_v34 }
 0x9ae   : > { %v1494_v39 = vpop.f32.mrb[10].mxu1 }
 0x9af   : > { %v1495_v15 = vadd.f32 1e-05, %v1494_v39  ;;  %v1911_v40 = vpop.f32.mrb[11].mxu1 }
 0x9b1   : > { %2123 = vrsqrt.f32 %v1495_v15 }
 0x9b2   : > { %2125 = vrcp.f32 %v1506_v41 }
 0x9bb   : > { %v2124_v42 = vpop.eup %2123 }
 0x9bc   : > { %v1499_v29 = vmul.f32 %v2124_v42, %v1349_v18  ;;  %v2126_v44 = vpop.eup %2125 }
 0x9bd   : > { %v1509_v49 = vmul.f32 %v2126_v44, %v622_v36 }
 0x9be   : > { %v1500_v46 = vmul.f32 %v1499_v29, %v515_v6 }
 0x9c0   : > { %v1501_v48 = vadd.f32 %v1500_v46, %v516_v33 }
 0x9c2   : > { %v1502_v50 = vadd.f32 %v1501_v48, %v784_v47 }
 0x9c4   : > { %v1510_v51 = vmul.f32 %v1509_v49, %v1502_v50 }
 0x9c6   : > { %1921 = vmatmul.mubr.msk.f32.vlgmr.msra.gmra.mrb[12].mxu1 %vm713_vm3, %v1510_v51 }
 0x9c7   : > { %2325 = shalt.err (!%p2322_p0)
}
 0x9c8   : > { %s3042_s10 = sld [smem:[#allocation30_spill]]  ;;  %p3043_p7 = pmov %p3041_p9 }
 0x9ce   : > { %s2326_s28 = scalar_lea.hbm %s3042_s10, 128 }
 0x9cf   : > { %p2327_p8 = scmp.ne.s32.totalorder %s3042_s10, %s2326_s28  ;;  %p2332_p11 = scmp.lt.u32.totalorder %s2326_s28, %s3042_s10 }
 0x9d1   : > { %p2328_p4 = pnand %p2327_p8, %p3043_p7 }
 0x9d3   : > { %p2329_p6 = pneg %p2328_p4 }
 0x9d5   : > { %p2334_p2 = pnand %p2332_p11, %p2329_p6 }
 0x9d7   : > { %2337 = shalt.err (!%p2334_p2)
}
 0x9d8   : > { %p3044_p5 = pmov %p3043_p7  ;;  %v517_v28 = vld [vmem:[%s2998_s6 + $0x7] ss:$0 sm:$0xff]  ;;  %s1827_s3 = sshll.u32 %s2532_s23, 7 }
 0x9d9   : > { %s1626_s16 = sshll.u32 %s2780_s24, 4  ;;  %s3045_s30 = sld [smem:[#allocation29_spill]]  ;;  %s2946_s16 = int_to_ptr.vmem [resolvable:$true] %s1626_s16 }
 0x9da   : > { %2003 = dma.vmem_to_hbm [thread:$0]  (%p3044_p5), %s1638_s12, 128, %s3042_s10, [#allocation18]  }
 0x9db   : > { %s1613_s12 = scalar_lea.sflag [#allocation5], %s2756_s27  ;;  %s2338_s29 = scalar_lea.vmem %s2946_s16, 128 }
 0x9dc   : > { %p2339_p9 = scmp.ne.s32.totalorder %s2946_s16, %s2338_s29  ;;  %p3046_p3 = scmp.ne.s32.totalorder %s3027_s22, 0 }
 0x9dd   : > { %s2450_s26 = smov [#allocation16]  }
 0x9de   : > { %p2340_p10 = pnand %p2339_p9, %p3046_p3  ;;  %s2342_s25 = sshll.u32 %s2450_s26, 4  ;;  %s2343_s25 = int_to_ptr.vmem [resolvable:$false] %s2342_s25 }
 0x9df   : > { %s2944_s13 = scalar_lea.hbm %s3045_s30, %s1827_s3  ;;  %s2344_s8 = scalar_lea.vmem %s2343_s25, 256 }
 0x9e0   : > { %p2341_p1 = pneg %p2340_p10  ;;  %p2345_p12 = scmp.lt.s32.totalorder %s2946_s16, %s2343_s25 }
 0x9e1   : > { %p2346_p13 = scmp.lt.s32.totalorder %s2344_s8, %s2338_s29 }
 0x9e3   : > { %p2347_p0 = por %p2346_p13, %p2345_p12 }
 0x9e5   : > { %p2348_p8 = pnand %p2347_p0, %p2341_p1 }
 0xa99   : > { %v1584_v45 = vpop.f32.mrb[12].mxu1 }
 0xa9a   : > { %v1585_v32 = vadd.f32 %v1584_v45, %v517_v28  ;;  %v1922_v52 = vpop.f32.mrb[13].mxu1 }
 0xa9c   : > { %v1588_v53 = vadd.f32 %v1585_v32, %v2784_v3 }
 0xa9e   : > { %1589 = vst [vmem:[%s2780_s24] sm:$0xff] %v1588_v53 }
 0xa9f   : > { %2351 = shalt.err (!%p2348_p8)
}
 0xaa0   : > { %s2352_s27 = scalar_lea.hbm %s2944_s13, 128  ;;  %s2356_s3 = scalar_lea.hbm %s3045_s30, 1536 }
 0xaa1   : > { %p2353_p7 = scmp.ne.s32.totalorder %s2944_s13, %s2352_s27  ;;  %p2357_p11 = scmp.lt.u32.totalorder %s2944_s13, %s3045_s30 }
 0xaa2   : > { %p2358_p2 = scmp.lt.u32.totalorder %s2356_s3, %s2352_s27  ;;  %p2360_p9 = scmp.lt.u32.totalorder %s2352_s27, %s2944_s13 }
 0xaa3   : > { %p2354_p4 = pnand %p2353_p7, %p3046_p3 }
 0xaa4   : > { %p2359_p5 = por %p2358_p2, %p2357_p11 }
 0xaa5   : > { %p2355_p6 = pneg %p2354_p4 }
 0xaa6   : > { %p2361_p10 = por %p2360_p9, %p2359_p5 }
 0xaa8   : > { %p2362_p1 = pnand %p2361_p10, %p2355_p6 }
 0xaaa   : > { %2365 = shalt.err (!%p2362_p1)
}
 0xaab   : > { %2001 = dma.vmem_to_hbm [thread:$0]  (%p3046_p3), %s2946_s16, 128, %s2944_s13, %s1613_s12  }
 0xaac   : > { %p3047_p12 = scmp.eq.s32.totalorder %s2532_s23, 11 }
 0xaae   : > { %2403 = dma.done.wait (%p3047_p12), [#allocation18], 128   ;;  %p3048_p13 = pmov %p3047_p12 }
 0xab0   : > { %2405 = vsyncadd (%p3048_p13), [#allocation18], 4294967168 }
 0xab1 PF: > { %p2049_p0 = scmp.ge.s32.totalorder %s2424_s20, 2  ;;  %s1653_s29 = sand.u32 1, %s2412_s17  }
 0xab2   : > { %p3049_p8 = scmp.ne.s32.totalorder %s3028_s11, 0  ;;  %s1654_s26 = scalar_lea.sflag [#allocation5], %s1653_s29 }
 0xab4   : > { %p2031_p7 = pnand %p2049_p0, %p3049_p8 }
 0xab6   : > { %2407 = dma.done.wait (!%p2031_p7), %s1654_s26, 128  }
 0xab7   : > { %2409 = vsyncadd (!%p2031_p7), %s1654_s26, 4294967168  ;;  %p30_p3 = scmp.ge.s32.totalorder %s2678_s21, 14   ;;  %s3050_s17 = smov %s2416_s18 }
 0xab8   : > { %s3051_s18 = smov %s2420_s19  ;;  %s3052_s19 = smov %s2689_s15 }
 0xab9   : > { %s3053_s20 = smov %s2678_s21  ;;  %32 = sbr.rel (!%p30_p3) target bundleno = 16 (0x10), region = 147 }
 0xac0   :  { %1659 = vsyncpa [#allocation4], 1 }
 0xac1   :  { %1661 = vsyncpa [#allocation4 + $0x1], 1 }
 0xac2   :  { %1662 = vsyncpa [#allocation8], 1 }
 0xac3   :  { %1663 = vsyncpa [#allocation11], 1 }
 0xac4   :  { %1664 = vsyncpa [#allocation14], 1 }
 0xac5   :  { %1665 = vsyncpa [#allocation5], 1 }
 0xac6   :  { %1667 = vsyncpa [#allocation5 + $0x1], 1 }
 0xac7   :  { %1668 = vsyncpa [#allocation18], 1 }
 0xac8   :  { %1669 = vsyncpa [#allocation6], 1 }
 0xac9   :  { %1671 = vsyncpa [#allocation6 + $0x1], 1 }

</bundles_post_ra>
